<compile_context>
chip_gen: v7x
topology: tpu7x:2x2x1
jax: 0.10.0
libtpu: 0.0.40
codegen_flags: <defaults>
</compile_context>

<pallas_src>
import jax
import jax.numpy as jnp
from jax import lax
from jax.experimental import pallas as pl
from jax.experimental.pallas import tpu as pltpu

_BN_EPS = 0.001


def _fused_kernel(x93_ref, w1_ref, b1_ref, x_ref, w2_ref, gamma_ref, beta_ref,
                  o_ref):
    # --- conv2d27 (20 -> 320, 1x1, bias) on the squeezed SE vector -----------
    # (320,20) * (1,20) broadcast, lane-reduce -> (320,1), + bias.  Done on
    # VPU+XLU so the tiny M=1 projection doesn't waste an MXU pass.
    se = jnp.sum(w1_ref[...] * x93_ref[...], axis=1, keepdims=True) \
        + b1_ref[...]                                                   # (320, 1)
    se = jax.nn.sigmoid(se)                                             # EUP

    # --- per-channel SE scale of the feature map (broadcast over lanes) ------
    xs = (x_ref[...] * se).astype(jnp.bfloat16)                         # (320, 196)

    # --- conv2d28 (320 -> 160, 1x1, no bias) == channel matmul ---------------
    # bf16 operands, f32 accumulation on the MXU (BN re-normalizes the output,
    # so the bf16 quantization impact is tiny).
    y = jnp.dot(w2_ref[...].astype(jnp.bfloat16), xs,
                preferred_element_type=jnp.float32)                     # (160, 196)

    # --- BatchNorm2d(160), training mode: biased batch stats over N*H*W ------
    # Centered two-pass variance (cancellation-safe), folded into one
    # per-channel scale/shift.
    inv_n = jnp.float32(1.0 / y.shape[1])
    mean = jnp.sum(y, axis=1, keepdims=True) * inv_n                    # (160, 1)
    d = y - mean                                                        # (160, 196)
    var = jnp.sum(d * d, axis=1, keepdims=True) * inv_n                 # biased var
    scale = gamma_ref[...] * lax.rsqrt(var + _BN_EPS)                   # (160, 1)
    o_ref[...] = d * scale + beta_ref[...]
    # TODO(synk): BatchNorm running_mean/running_var momentum updates (a
    # training-mode buffer side effect of the PyTorch module) are not emitted;
    # only the normalized forward output is produced.


def fused_se_conv_bn(x93, x90, w1, b1, w2, gamma, beta):
    """x93: (1,20,1,1), x90: (1,320,14,14)  ->  (1,160,14,14), float32 out."""
    N, C_in, H, W = x90.shape          # (1, 320, 14, 14)
    assert N == 1, "channel-major free reshape assumes batch size 1"
    C_se = x93.shape[1]                # 20
    C_out = w2.shape[0]                # 160
    HW = N * H * W                     # 196

    # Pure reshapes of contiguous buffers — bitcasts only, no transposes,
    # concats, stacks or dtype converts in the wrapper.
    x = x90.reshape(C_in, HW)                  # (320, 196)
    x93r = x93.reshape(1, C_se)                # (1, 20)
    w1r = w1.reshape(C_in, C_se)               # (320, 20)
    b1r = b1.reshape(C_in, 1)                  # (320, 1)
    w2r = w2.reshape(C_out, C_in)              # (160, 320)
    gr = gamma.reshape(C_out, 1)               # (160, 1)
    br = beta.reshape(C_out, 1)                # (160, 1)

    vmem = pl.BlockSpec(memory_space=pltpu.MemorySpace.VMEM)
    cost = pl.CostEstimate(
        flops=2 * C_out * C_in * HW            # main matmul
        + 2 * C_in * C_se                      # SE projection
        + 6 * C_out * HW + 2 * C_in * HW,      # BN stats/apply + SE scale
        transcendentals=C_in,                  # sigmoid(320)
        bytes_accessed=4 * (C_in * HW + C_out * C_in + C_in * C_se
                            + C_in + C_se + 2 * C_out + C_out * HW),
    )

    out = pl.pallas_call(
        _fused_kernel,
        out_shape=jax.ShapeDtypeStruct((C_out, HW), jnp.float32),
        in_specs=[vmem] * 7,
        out_specs=vmem,
        cost_estimate=cost,
    )(x93r, w1r, b1r, x, w2r, gr, br)

    # back to NCHW — a pure reshape, no transpose
    return out.reshape(N, C_out, H, W)


fused_se_conv_bn_jit = jax.jit(fused_se_conv_bn)


if __name__ == "__main__":
    key = jax.random.PRNGKey(0)
    k1, k2, k3, k4, k5 = jax.random.split(key, 5)

    # inputs (shapes from the module's forward)
    x93 = jax.random.normal(k1, (1, 20, 1, 1), dtype=jnp.float32)
    x90 = jax.random.normal(k2, (1, 320, 14, 14), dtype=jnp.float32)

    # deterministic synthetic parameters
    w1 = jax.random.normal(k3, (320, 20, 1, 1), dtype=jnp.float32) * 0.1    # conv2d27.weight
    b1 = jax.random.normal(k4, (320,), dtype=jnp.float32) * 0.1             # conv2d27.bias
    w2 = jax.random.normal(k5, (160, 320, 1, 1), dtype=jnp.float32) * 0.05  # conv2d28.weight
    gamma = jnp.ones((160,), dtype=jnp.float32)                             # bn weight
    beta = jnp.zeros((160,), dtype=jnp.float32)                             # bn bias

    out = fused_se_conv_bn_jit(x93, x90, w1, b1, w2, gamma, beta)
    jax.block_until_ready(out)
    assert out.shape == (1, 160, 14, 14)
    print("KERNEL_OK")
</pallas_src>

<mosaic_0001>
module attributes {stable_mosaic.version = 11 : i64} {
  func.func @_fused_kernel(%arg0: memref<1x20xf32, #tpu.memory_space<vmem>>, %arg1: memref<320x20xf32, #tpu.memory_space<vmem>>, %arg2: memref<320x1xf32, #tpu.memory_space<vmem>>, %arg3: memref<320x196xf32, #tpu.memory_space<vmem>>, %arg4: memref<160x320xf32, #tpu.memory_space<vmem>>, %arg5: memref<160x1xf32, #tpu.memory_space<vmem>>, %arg6: memref<160x1xf32, #tpu.memory_space<vmem>>, %arg7: memref<160x196xf32, #tpu.memory_space<vmem>>) attributes {dimension_semantics = [], scalar_prefetch = 0 : i64, scratch_operands = 0 : i64, tpu.core_type = #tpu.core_type<tc>} {
    %c0 = arith.constant 0 : index
    %c0_0 = arith.constant 0 : index
    %0 = vector.load %arg1[%c0, %c0_0] : memref<320x20xf32, #tpu.memory_space<vmem>>, vector<320x20xf32>
    %c0_1 = arith.constant 0 : index
    %c0_2 = arith.constant 0 : index
    %1 = vector.load %arg0[%c0_1, %c0_2] : memref<1x20xf32, #tpu.memory_space<vmem>>, vector<1x20xf32>
    %2 = vector.broadcast %1 : vector<1x20xf32> to vector<320x20xf32>
    %3 = arith.mulf %0, %2 : vector<320x20xf32>
    %cst = arith.constant dense<0.000000e+00> : vector<320xf32>
    %4 = vector.multi_reduction <add>, %3, %cst [1] : vector<320x20xf32> to vector<320xf32>
    %5 = vector.shape_cast %4 : vector<320xf32> to vector<320x1xf32>
    %c0_3 = arith.constant 0 : index
    %c0_4 = arith.constant 0 : index
    %6 = vector.load %arg2[%c0_3, %c0_4] : memref<320x1xf32, #tpu.memory_space<vmem>>, vector<320x1xf32>
    %7 = arith.addf %5, %6 : vector<320x1xf32>
    %8 = arith.negf %7 : vector<320x1xf32>
    %9 = math.exp %8 : vector<320x1xf32>
    %cst_5 = arith.constant 1.000000e+00 : f32
    %10 = vector.broadcast %cst_5 : f32 to vector<320x1xf32>
    %11 = arith.addf %10, %9 : vector<320x1xf32>
    %12 = arith.divf %10, %11 : vector<320x1xf32>
    %c0_6 = arith.constant 0 : index
    %c0_7 = arith.constant 0 : index
    %13 = vector.load %arg3[%c0_6, %c0_7] : memref<320x196xf32, #tpu.memory_space<vmem>>, vector<320x196xf32>
    %14 = vector.broadcast %12 : vector<320x1xf32> to vector<320x196xf32>
    %15 = arith.mulf %13, %14 : vector<320x196xf32>
    %16 = arith.truncf %15 : vector<320x196xf32> to vector<320x196xbf16>
    %c0_8 = arith.constant 0 : index
    %c0_9 = arith.constant 0 : index
    %17 = vector.load %arg4[%c0_8, %c0_9] : memref<160x320xf32, #tpu.memory_space<vmem>>, vector<160x320xf32>
    %18 = arith.truncf %17 : vector<160x320xf32> to vector<160x320xbf16>
    %cst_10 = arith.constant dense<0.000000e+00> : vector<160x196xf32>
    %19 = tpu.matmul %18, %16, %cst_10 {dimension_numbers = #tpu.dot_dimension_numbers<[1], [0], [0], [1], [0, 0, 1, 1], [], []>} : vector<160x320xbf16>, vector<320x196xbf16>, vector<160x196xf32> -> vector<160x196xf32>
    %cst_11 = arith.constant dense<0.000000e+00> : vector<160xf32>
    %20 = vector.multi_reduction <add>, %19, %cst_11 [1] : vector<160x196xf32> to vector<160xf32>
    %21 = vector.shape_cast %20 : vector<160xf32> to vector<160x1xf32>
    %cst_12 = arith.constant 0.00510204071 : f32
    %22 = vector.broadcast %cst_12 : f32 to vector<160x1xf32>
    %23 = arith.mulf %21, %22 : vector<160x1xf32>
    %24 = vector.broadcast %23 : vector<160x1xf32> to vector<160x196xf32>
    %25 = arith.subf %19, %24 : vector<160x196xf32>
    %26 = arith.mulf %25, %25 : vector<160x196xf32>
    %cst_13 = arith.constant dense<0.000000e+00> : vector<160xf32>
    %27 = vector.multi_reduction <add>, %26, %cst_13 [1] : vector<160x196xf32> to vector<160xf32>
    %28 = vector.shape_cast %27 : vector<160xf32> to vector<160x1xf32>
    %cst_14 = arith.constant 0.00510204071 : f32
    %29 = vector.broadcast %cst_14 : f32 to vector<160x1xf32>
    %30 = arith.mulf %28, %29 : vector<160x1xf32>
    %c0_15 = arith.constant 0 : index
    %c0_16 = arith.constant 0 : index
    %31 = vector.load %arg5[%c0_15, %c0_16] : memref<160x1xf32, #tpu.memory_space<vmem>>, vector<160x1xf32>
    %cst_17 = arith.constant 1.000000e-03 : f32
    %32 = vector.broadcast %cst_17 : f32 to vector<160x1xf32>
    %33 = arith.addf %30, %32 : vector<160x1xf32>
    %34 = math.rsqrt %33 : vector<160x1xf32>
    %35 = arith.mulf %31, %34 : vector<160x1xf32>
    %36 = vector.broadcast %35 : vector<160x1xf32> to vector<160x196xf32>
    %37 = arith.mulf %25, %36 : vector<160x196xf32>
    %c0_18 = arith.constant 0 : index
    %c0_19 = arith.constant 0 : index
    %38 = vector.load %arg6[%c0_18, %c0_19] : memref<160x1xf32, #tpu.memory_space<vmem>>, vector<160x1xf32>
    %39 = vector.broadcast %38 : vector<160x1xf32> to vector<160x196xf32>
    %40 = arith.addf %37, %39 : vector<160x196xf32>
    %c0_20 = arith.constant 0 : index
    %c0_21 = arith.constant 0 : index
    %41 = vector.load %arg7[%c0_20, %c0_21] : memref<160x196xf32, #tpu.memory_space<vmem>>, vector<160x196xf32>
    tpu.vector_store %arg7[%c0_20, %c0_21], %40 {strides = array<i32>} : memref<160x196xf32, #tpu.memory_space<vmem>>, vector<160x196xf32>,
    return
  }
}

</mosaic_0001>

<bundles_post_ra>
// kernel: fused_se_conv_bn.1
= control target key start
LH: loop header
LB: loop body
LE: loop exit
PB: predicated region body
PF: predicated region fallthrough
CT: control target
= control target key end

     0   :  { %vm114_vm0 = vcmask 162816   ;;  %vm1045_vm1 = vcmask 523264   ;;  %vm1342_vm2 = vcmask 556032   ;;  %s3905_s0 = inlined_call_operand.vmem [shape: f32[1,20], index: 0, kind: input, shape index: {}]   ;;  %s3906_s1 = inlined_call_operand.vmem [shape: f32[320,20], index: 1, kind: input, shape index: {}]   ;;  %s3907_s2 = inlined_call_operand.vmem [shape: f32[320,1], index: 2, kind: input, shape index: {}]   ;;  %s3908_s6 = inlined_call_operand.vmem [shape: f32[160,1], index: 6, kind: input, shape index: {}]   ;;  %s3909_s4 = inlined_call_operand.vmem [shape: f32[160,320], index: 4, kind: input, shape index: {}]   ;;  %s3910_s3 = inlined_call_operand.vmem [shape: f32[320,196], index: 3, kind: input, shape index: {}]   ;;  %s3911_s5 = inlined_call_operand.vmem [shape: f32[160,1], index: 5, kind: input, shape index: {}]   ;;  %s3912_s7 = inlined_call_operand.vmem [shape: f32[160,196], index: 7, kind: output, shape index: {}]  }
   0x1   :  { %v29_v0 = vld [vmem:[%s3906_s1 + $0x10] sm:$0xff]  ;;  %v2388_v1 = vld [vmem:[%s3905_s0] ss:$0 sm:$0xff]  ;;  %v30_v5 = vld [vmem:[%s3906_s1 + $0x18] sm:$0xff] }
   0x2   :  { %v27_v2 = vld [vmem:[%s3906_s1] sm:$0xff]  ;;  %v76_v3 = vmul.f32 %v2388_v1, %v29_v0  ;;  %v28_v6 = vld [vmem:[%s3906_s1 + $0x8] sm:$0xff]  ;;  %v77_v7 = vmul.f32 %v2388_v1, %v30_v5  ;;  %v34_v17 = vld [vmem:[%s3906_s1 + $0x38] sm:$0xff] }
   0x3   :  { %v74_v4 = vmul.f32 %v2388_v1, %v27_v2  ;;  %v75_v8 = vmul.f32 %v2388_v1, %v28_v6  ;;  %v32_v9 = vld [vmem:[%s3906_s1 + $0x28] sm:$0xff]  ;;  %v31_v10 = vld [vmem:[%s3906_s1 + $0x20] sm:$0xff]  ;;  %v33_v18 = vld [vmem:[%s3906_s1 + $0x30] sm:$0xff]  ;;  %v81_v20 = vmul.f32 %v2388_v1, %v34_v17 }
   0x4   :  { %v121_v11 = vsel %vm114_vm0, %v76_v3, 0.0  ;;  %v124_v13 = vsel %vm114_vm0, %v77_v7, 0.0  ;;  %v79_v15 = vmul.f32 %v2388_v1, %v32_v9  ;;  %v78_v16 = vmul.f32 %v2388_v1, %v31_v10  ;;  %v36_v21 = vld [vmem:[%s3906_s1 + $0x48] sm:$0xff]  ;;  %v35_v24 = vld [vmem:[%s3906_s1 + $0x40] sm:$0xff]  ;;  %v38_v29 = vld [vmem:[%s3906_s1 + $0x58] sm:$0xff] }
   0x5   :  { %v115_v12 = vsel %vm114_vm0, %v74_v4, 0.0  ;;  %122 = vadd.xlane.f32.xlu1 %v121_v11  ;;  %v118_v14 = vsel %vm114_vm0, %v75_v8, 0.0  ;;  %v80_v23 = vmul.f32 %v2388_v1, %v33_v18  ;;  %v56_v25 = vld [vmem:[%s3906_s1 + $0xe8] sm:$0xff]  ;;  %v83_v26 = vmul.f32 %v2388_v1, %v36_v21  ;;  %v37_v32 = vld [vmem:[%s3906_s1 + $0x50] sm:$0xff]  ;;  %v58_v34 = vld [vmem:[%s3906_s1 + $0xf8] sm:$0xff] }
   0x6   :  { %116 = vadd.xlane.f32.xlu0 %v115_v12  ;;  %v130_v19 = vsel %vm114_vm0, %v79_v15, 0.0  ;;  %v127_v22 = vsel %vm114_vm0, %v78_v16, 0.0  ;;  %v64_v27 = vld [vmem:[%s3906_s1 + $0x128] sm:$0xff]  ;;  %v136_v28 = vsel %vm114_vm0, %v81_v20, 0.0  ;;  %v82_v31 = vmul.f32 %v2388_v1, %v35_v24  ;;  %v66_v36 = vld [vmem:[%s3906_s1 + $0x138] sm:$0xff]  ;;  %v55_v37 = vld [vmem:[%s3906_s1 + $0xe0] sm:$0xff] }
   0x7   :  { %v133_v30 = vsel %vm114_vm0, %v80_v23, 0.0  ;;  %v103_v33 = vmul.f32 %v2388_v1, %v56_v25  ;;  %v111_v35 = vmul.f32 %v2388_v1, %v64_v27  ;;  %v142_v38 = vsel %vm114_vm0, %v83_v26, 0.0  ;;  %v40_v40 = vld [vmem:[%s3906_s1 + $0x68] sm:$0xff]  ;;  %v63_v42 = vld [vmem:[%s3906_s1 + $0x120] sm:$0xff]  ;;  %v57_v43 = vld [vmem:[%s3906_s1 + $0xf0] sm:$0xff] }
   0x8   :  { %v85_v39 = vmul.f32 %v2388_v1, %v38_v29  ;;  %v139_v44 = vsel %vm114_vm0, %v82_v31, 0.0  ;;  %v84_v45 = vmul.f32 %v2388_v1, %v37_v32  ;;  %v105_v47 = vmul.f32 %v2388_v1, %v58_v34  ;;  %v65_v48 = vld [vmem:[%s3906_s1 + $0x130] sm:$0xff]  ;;  %v39_v49 = vld [vmem:[%s3906_s1 + $0x60] sm:$0xff]  ;;  %v42_v0 = vld [vmem:[%s3906_s1 + $0x78] sm:$0xff] }
   0x9   :  { %125 = vadd.xlane.f32.xlu1 %v124_v13  ;;  %v2464_v41 = vsel %vm114_vm0, %v103_v33, 0.0  ;;  %v2475_v46 = vsel %vm114_vm0, %v111_v35, 0.0  ;;  %v113_v50 = vmul.f32 %v2388_v1, %v66_v36  ;;  %v102_v51 = vmul.f32 %v2388_v1, %v55_v37  ;;  %v41_v2 = vld [vmem:[%s3906_s1 + $0x70] sm:$0xff]  ;;  %v44_v8 = vld [vmem:[%s3906_s1 + $0x88] sm:$0xff]  ;;  %v43_v9 = vld [vmem:[%s3906_s1 + $0x80] sm:$0xff] }
   0xa   :  { %119 = vadd.xlane.f32.xlu0 %v118_v14  ;;  %v87_v52 = vmul.f32 %v2388_v1, %v40_v40  ;;  %v2488_v53 = vsel %vm114_vm0, %v105_v47, 0.0  ;;  %v110_v54 = vmul.f32 %v2388_v1, %v63_v42  ;;  %v104_v55 = vmul.f32 %v2388_v1, %v57_v43  ;;  %v46_v14 = vld [vmem:[%s3906_s1 + $0x98] sm:$0xff]  ;;  %v45_v15 = vld [vmem:[%s3906_s1 + $0x90] sm:$0xff]  ;;  %v48_v20 = vld [vmem:[%s3906_s1 + $0xa8] sm:$0xff] }
   0xb   :  { %v148_v56 = vsel %vm114_vm0, %v85_v39, 0.0  ;;  %v2494_v57 = vsel %vm114_vm0, %v113_v50, 0.0  ;;  %v2497_v58 = vsel %vm114_vm0, %v102_v51, 0.0  ;;  %v112_v59 = vmul.f32 %v2388_v1, %v65_v48  ;;  %v47_v21 = vld [vmem:[%s3906_s1 + $0xa0] sm:$0xff]  ;;  %v50_v26 = vld [vmem:[%s3906_s1 + $0xb8] sm:$0xff]  ;;  %v49_v27 = vld [vmem:[%s3906_s1 + $0xb0] sm:$0xff] }
   0xc   :  { %v145_v60 = vsel %vm114_vm0, %v84_v45, 0.0  ;;  %v86_v61 = vmul.f32 %v2388_v1, %v39_v49  ;;  %v2503_v62 = vsel %vm114_vm0, %v110_v54, 0.0  ;;  %v2506_v63 = vsel %vm114_vm0, %v104_v55, 0.0  ;;  %v51_v33 = vld [vmem:[%s3906_s1 + $0xc0] sm:$0xff]  ;;  %v54_v47 = vld [vmem:[%s3906_s1 + $0xd8] sm:$0xff]  ;;  %v53_v48 = vld [vmem:[%s3906_s1 + $0xd0] sm:$0xff] }
   0xd   :  { %131 = vadd.xlane.f32.xlu1 %v130_v19  ;;  %v2515_v3 = vsel %vm114_vm0, %v112_v59, 0.0  ;;  %v154_v4 = vsel %vm114_vm0, %v87_v52, 0.0  ;;  %v89_v5 = vmul.f32 %v2388_v1, %v42_v0  ;;  %v88_v7 = vmul.f32 %v2388_v1, %v41_v2  ;;  %v59_v39 = vld [vmem:[%s3906_s1 + $0x100] sm:$0xff]  ;;  %v62_v54 = vld [vmem:[%s3906_s1 + $0x118] sm:$0xff]  ;;  %v61_v55 = vld [vmem:[%s3906_s1 + $0x110] sm:$0xff] }
   0xe   :  { %128 = vadd.xlane.f32.xlu0 %v127_v22  ;;  %v151_v6 = vsel %vm114_vm0, %v86_v61, 0.0  ;;  %v91_v11 = vmul.f32 %v2388_v1, %v44_v8  ;;  %v90_v13 = vmul.f32 %v2388_v1, %v43_v9  ;;  %v93_v17 = vmul.f32 %v2388_v1, %v46_v14  ;;  %v240_v9 = vld [vmem:[%s3907_s2 + $0x28] sm:$0xff] }
   0xf   :  { %v160_v10 = vsel %vm114_vm0, %v89_v5, 0.0  ;;  %v157_v12 = vsel %vm114_vm0, %v88_v7, 0.0  ;;  %v92_v19 = vmul.f32 %v2388_v1, %v45_v15  ;;  %v95_v23 = vmul.f32 %v2388_v1, %v48_v20 }
  0x10   :  { %v166_v16 = vsel %vm114_vm0, %v91_v11, 0.0  ;;  %v163_v18 = vsel %vm114_vm0, %v90_v13, 0.0  ;;  %v172_v22 = vsel %vm114_vm0, %v93_v17, 0.0  ;;  %v94_v25 = vmul.f32 %v2388_v1, %v47_v21 }
  0x11   :  { %137 = vadd.xlane.f32.xlu1 %v136_v28  ;;  %v169_v24 = vsel %vm114_vm0, %v92_v19, 0.0  ;;  %v178_v28 = vsel %vm114_vm0, %v95_v23, 0.0  ;;  %v97_v29 = vmul.f32 %v2388_v1, %v50_v26  ;;  %v96_v32 = vmul.f32 %v2388_v1, %v49_v27  ;;  %v241_v19 = vld [vmem:[%s3907_s2 + $0x30] sm:$0xff]  ;;  %v243_v27 = vld [vmem:[%s3907_s2 + $0x40] sm:$0xff] }
  0x12   :  { %134 = vadd.xlane.f32.xlu0 %v133_v30  ;;  %v52_v30 = vld [vmem:[%s3906_s1 + $0xc8] sm:$0xff]  ;;  %v175_v31 = vsel %vm114_vm0, %v94_v25, 0.0  ;;  %v98_v37 = vmul.f32 %v2388_v1, %v51_v33  ;;  %v2341_v40 = vmov 0   ;;  %v106_v45 = vmul.f32 %v2388_v1, %v59_v39  ;;  %v246_v33 = vld [vmem:[%s3907_s2 + $0x58] sm:$0xff] }
  0x13   :  { %v99_v34 = vmul.f32 %v2388_v1, %v52_v30  ;;  %v184_v35 = vsel %vm114_vm0, %v97_v29, 0.0  ;;  %v181_v36 = vsel %vm114_vm0, %v96_v32, 0.0  ;;  %2139 = vset.pattern.permute.xlu0 %v2341_v40  ;;  %2140 = vset.pattern.permute.xlu1 %v2341_v40  ;;  %v101_v50 = vmul.f32 %v2388_v1, %v54_v47 }
  0x14   :  { %1241 = vmatprep.mubr.bf16.mxu0 %v2341_v40  ;;  %v211_v51 = vsel %vm114_vm0, %v106_v45, 0.0  ;;  %v100_v52 = vmul.f32 %v2388_v1, %v53_v48  ;;  %v109_v59 = vmul.f32 %v2388_v1, %v62_v54  ;;  %v108_v61 = vmul.f32 %v2388_v1, %v61_v55  ;;  %v248_v48 = vld [vmem:[%s3907_s2 + $0x68] sm:$0xff] }
  0x15   :  { %143 = vadd.xlane.f32.xlu1 %v142_v38  ;;  %v60_v38 = vld [vmem:[%s3906_s1 + $0x108] sm:$0xff]  ;;  %v190_v42 = vsel %vm114_vm0, %v99_v34, 0.0 }
  0x16   :  { %140 = vadd.xlane.f32.xlu0 %v139_v44  ;;  %v107_v43 = vmul.f32 %v2388_v1, %v60_v38  ;;  %v187_v44 = vsel %vm114_vm0, %v98_v37, 0.0  ;;  %v220_v0 = vsel %vm114_vm0, %v109_v59, 0.0  ;;  %v217_v2 = vsel %vm114_vm0, %v108_v61, 0.0  ;;  %v237_v1 = vld [vmem:[%s3907_s2 + $0x10] sm:$0xff] }
  0x18   :  { %v214_v49 = vsel %vm114_vm0, %v107_v43, 0.0 }
  0x19   :  { %149 = vadd.xlane.f32.xlu1 %v148_v56  ;;  %v196_v56 = vsel %vm114_vm0, %v101_v50, 0.0 }
  0x1a   :  { %146 = vadd.xlane.f32.xlu0 %v145_v60  ;;  %v193_v60 = vsel %vm114_vm0, %v100_v52, 0.0 }
  0x1d   :  { %155 = vadd.xlane.f32.xlu1 %v154_v4 }
  0x1e   :  { %152 = vadd.xlane.f32.xlu0 %v151_v6 }
  0x21   :  { %161 = vadd.xlane.f32.xlu1 %v160_v10  ;;  %v239_v10 = vld [vmem:[%s3907_s2 + $0x20] sm:$0xff] }
  0x22   :  { %158 = vadd.xlane.f32.xlu0 %v157_v12 }
  0x25   :  { %167 = vadd.xlane.f32.xlu1 %v166_v16 }
  0x26   :  { %164 = vadd.xlane.f32.xlu0 %v163_v18 }
  0x29   :  { %173 = vadd.xlane.f32.xlu1 %v172_v22  ;;  %v244_v22 = vld [vmem:[%s3907_s2 + $0x48] sm:$0xff] }
  0x2a   :  { %170 = vadd.xlane.f32.xlu0 %v169_v24  ;;  %v242_v24 = vld [vmem:[%s3907_s2 + $0x38] sm:$0xff] }
  0x2d   :  { %179 = vadd.xlane.f32.xlu1 %v178_v28 }
  0x2e   :  { %176 = vadd.xlane.f32.xlu0 %v175_v31 }
  0x31   :  { %185 = vadd.xlane.f32.xlu1 %v184_v35 }
  0x32   :  { %182 = vadd.xlane.f32.xlu0 %v181_v36 }
  0x35   :  { %191 = vadd.xlane.f32.xlu1 %v190_v42 }
  0x36   :  { %188 = vadd.xlane.f32.xlu0 %v187_v44 }
  0x39   :  { %215 = vadd.xlane.f32.xlu1 %v214_v49  ;;  %v245_v49 = vld [vmem:[%s3907_s2 + $0x50] sm:$0xff] }
  0x3a   :  { %212 = vadd.xlane.f32.xlu0 %v211_v51 }
  0x3d   :  { %197 = vadd.xlane.f32.xlu1 %v196_v56 }
  0x3e   :  { %194 = vadd.xlane.f32.xlu0 %v193_v60 }
  0x41   :  { %221 = vadd.xlane.f32.xlu1 %v220_v0  ;;  %v247_v0 = vld [vmem:[%s3907_s2 + $0x60] sm:$0xff] }
  0x42   :  { %218 = vadd.xlane.f32.xlu0 %v217_v2  ;;  %v250_v2 = vld [vmem:[%s3907_s2 + $0x78] sm:$0xff] }
  0x45   :  { %203 = vadd.xlane.f32.xlu1 %v2464_v41  ;;  %v235_v41 = vld [vmem:[%s3907_s2] sm:$0xff] }
  0x46   :  { %200 = vadd.xlane.f32.xlu0 %v2497_v58 }
  0x49   :  { %227 = vadd.xlane.f32.xlu1 %v2475_v46 }
  0x4a   :  { %224 = vadd.xlane.f32.xlu0 %v2503_v62 }
  0x4d   :  { %209 = vadd.xlane.f32.xlu1 %v2488_v53  ;;  %v238_v53 = vld [vmem:[%s3907_s2 + $0x18] sm:$0xff] }
  0x4e   :  { %206 = vadd.xlane.f32.xlu0 %v2506_v63 }
  0x51   :  { %233 = vadd.xlane.f32.xlu1 %v2494_v57  ;;  %v236_v57 = vld [vmem:[%s3907_s2 + $0x8] sm:$0xff] }
  0x52   :  { %230 = vadd.xlane.f32.xlu0 %v2515_v3 }
  0x92   :  { %v123_v58 = vpop.xlane.xlu1 %122 }
  0x93   :  { %v117_v46 = vpop.xlane.xlu0 %116  ;;  %v277_v4 = vadd.f32 %v237_v1, %v123_v58 }
  0x94   :  { %v275_v62 = vadd.f32 %v235_v41, %v117_v46 }
  0x95   :  { %v2050_v63 = vmul.f32 -1.442695, %v277_v4 }
  0x96   :  { %v2048_v3 = vmul.f32 -1.442695, %v275_v62  ;;  %v126_v5 = vpop.xlane.xlu1 %125 }
  0x97   :  { %v120_v6 = vpop.xlane.xlu0 %119  ;;  %v278_v7 = vadd.f32 %v238_v53, %v126_v5  ;;  %v252_v5 = vld [vmem:[%s3907_s2 + $0x88] sm:$0xff] }
  0x98   :  { %v276_v8 = vadd.f32 %v236_v57, %v120_v6  ;;  %2141 = vpow2.f32 %v2048_v3  ;;  %v249_v3 = vld [vmem:[%s3907_s2 + $0x70] sm:$0xff] }
  0x99   :  { %2143 = vpow2.f32 %v2050_v63  ;;  %v2051_v11 = vmul.f32 -1.442695, %v278_v7 }
  0x9a   :  { %v2049_v12 = vmul.f32 -1.442695, %v276_v8  ;;  %v132_v13 = vpop.xlane.xlu1 %131 }
  0x9b   :  { %v129_v14 = vpop.xlane.xlu0 %128  ;;  %v280_v15 = vadd.f32 %v240_v9, %v132_v13 }
  0x9c   :  { %v279_v16 = vadd.f32 %v239_v10, %v129_v14  ;;  %2145 = vpow2.f32 %v2049_v12 }
  0x9d   :  { %2147 = vpow2.f32 %v2051_v11  ;;  %v2053_v17 = vmul.f32 -1.442695, %v280_v15 }
  0x9e   :  { %v2052_v18 = vmul.f32 -1.442695, %v279_v16  ;;  %v138_v20 = vpop.xlane.xlu1 %137 }
  0x9f   :  { %v135_v21 = vpop.xlane.xlu0 %134  ;;  %2149 = vpow2.f32 %v2053_v17  ;;  %v282_v32 = vadd.f32 %v242_v24, %v138_v20  ;;  %v254_v17 = vld [vmem:[%s3907_s2 + $0x98] sm:$0xff] }
  0xa0   :  { %v281_v23 = vadd.f32 %v241_v19, %v135_v21  ;;  %2151 = vpow2.f32 %v2052_v18  ;;  %v251_v21 = vld [vmem:[%s3907_s2 + $0x80] sm:$0xff] }
  0xa1   :  { %v2055_v47 = vmul.f32 -1.442695, %v282_v32 }
  0xa2   :  { %v2142_v25 = vpop.eup %2141  ;;  %v144_v26 = vpop.xlane.xlu1 %143  ;;  %v2054_v34 = vmul.f32 -1.442695, %v281_v23 }
  0xa3   :  { %v141_v28 = vpop.xlane.xlu0 %140  ;;  %v2144_v29 = vpop.eup %2143  ;;  %v435_v30 = vadd.f32 1.0, %v2142_v25  ;;  %v284_v31 = vadd.f32 %v244_v22, %v144_v26  ;;  %v253_v26 = vld [vmem:[%s3907_s2 + $0x90] sm:$0xff] }
  0xa4   :  { %v283_v36 = vadd.f32 %v243_v27, %v141_v28  ;;  %v437_v38 = vadd.f32 1.0, %v2144_v29 }
  0xa5   :  { %2153 = vrcp.f32 %v435_v30  ;;  %v2057_v35 = vmul.f32 -1.442695, %v284_v31  ;;  %v256_v31 = vld [vmem:[%s3907_s2 + $0xa8] sm:$0xff] }
  0xa6   :  { %v2146_v37 = vpop.eup %2145  ;;  %v150_v39 = vpop.xlane.xlu1 %149  ;;  %v2056_v51 = vmul.f32 -1.442695, %v283_v36 }
  0xa7   :  { %v147_v42 = vpop.xlane.xlu0 %146  ;;  %v2148_v43 = vpop.eup %2147  ;;  %v436_v44 = vadd.f32 1.0, %v2146_v37  ;;  %2155 = vpow2.f32 %v2057_v35  ;;  %v286_v45 = vadd.f32 %v246_v33, %v150_v39 }
  0xa8   :  { %2157 = vpow2.f32 %v2054_v34  ;;  %v438_v54 = vadd.f32 1.0, %v2148_v43  ;;  %v285_v61 = vadd.f32 %v245_v49, %v147_v42 }
  0xa9   :  { %2159 = vrcp.f32 %v436_v44  ;;  %v2059_v50 = vmul.f32 -1.442695, %v286_v45  ;;  %v2150_v52 = vpop.eup %2149  ;;  %v255_v45 = vld [vmem:[%s3907_s2 + $0xa0] sm:$0xff] }
  0xaa   :  { %2161 = vrcp.f32 %v437_v38  ;;  %v156_v55 = vpop.xlane.xlu1 %155  ;;  %v2152_v59 = vpop.eup %2151  ;;  %v440_v1 = vadd.f32 1.0, %v2150_v52  ;;  %v2058_v63 = vmul.f32 -1.442695, %v285_v61 }
  0xab   :  { %v153_v56 = vpop.xlane.xlu0 %152  ;;  %2163 = vpow2.f32 %v2059_v50  ;;  %v288_v60 = vadd.f32 %v248_v48, %v156_v55  ;;  %v439_v58 = vadd.f32 1.0, %v2152_v59  ;;  %v258_v48 = vld [vmem:[%s3907_s2 + $0xb8] sm:$0xff] }
  0xac   :  { %2165 = vpow2.f32 %v2055_v47  ;;  %v287_v4 = vadd.f32 %v247_v0, %v153_v56  ;;  %v257_v0 = vld [vmem:[%s3907_s2 + $0xb0] sm:$0xff] }
  0xad   :  { %v2061_v41 = vmul.f32 -1.442695, %v288_v60  ;;  %2167 = vpow2.f32 %v2056_v51 }
  0xae   :  { %2169 = vrcp.f32 %v438_v54  ;;  %v162_v46 = vpop.xlane.xlu1 %161  ;;  %v2060_v11 = vmul.f32 -1.442695, %v287_v4 }
  0xaf   :  { %v159_v62 = vpop.xlane.xlu0 %158  ;;  %v2154_v53 = vpop.eup %2153  ;;  %2171 = vpow2.f32 %v2061_v41  ;;  %v290_v57 = vadd.f32 %v250_v2, %v162_v46  ;;  %v260_v41 = vld [vmem:[%s3907_s2 + $0xc8] sm:$0xff] }
  0xb0   :  { %637 = vperm.xlu0 %2139, %v2154_v53   ;;  %2173 = vrcp.f32 %v440_v1  ;;  %v289_v12 = vadd.f32 %v249_v3, %v159_v62 }
  0xb1   :  { %v2156_v6 = vpop.eup %2155  ;;  %v2063_v7 = vmul.f32 -1.442695, %v290_v57  ;;  %2175 = vrcp.f32 %v439_v58 }
  0xb2   :  { %v2158_v8 = vpop.eup %2157  ;;  %v444_v9 = vadd.f32 1.0, %v2156_v6  ;;  %v168_v10 = vpop.xlane.xlu1 %167  ;;  %2177 = vpow2.f32 %v2058_v63  ;;  %v2062_v25 = vmul.f32 -1.442695, %v289_v12 }
  0xb3   :  { %v165_v13 = vpop.xlane.xlu0 %164  ;;  %v2160_v14 = vpop.eup %2159  ;;  %v292_v15 = vadd.f32 %v252_v5, %v168_v10  ;;  %v441_v19 = vadd.f32 1.0, %v2158_v8  ;;  %v259_v8 = vld [vmem:[%s3907_s2 + $0xc0] sm:$0xff]  ;;  %v268_v10 = vld [vmem:[%s3907_s2 + $0x108] sm:$0xff] }
  0xb4   :  { %v2162_v16 = vpop.eup %2161  ;;  %2179 = vrcp.f32 %v444_v9  ;;  %642 = vperm.xlu1 %2140, %v2160_v14   ;;  %v291_v32 = vadd.f32 %v251_v21, %v165_v13 }
  0xb5   :  { %v2164_v18 = vpop.eup %2163  ;;  %2181 = vpow2.f32 %v2063_v7  ;;  %v2065_v20 = vmul.f32 -1.442695, %v292_v15 }
  0xb6   :  { %v2166_v22 = vpop.eup %2165  ;;  %v446_v23 = vadd.f32 1.0, %v2164_v18  ;;  %v174_v24 = vpop.xlane.xlu1 %173  ;;  %2183 = vpow2.f32 %v2060_v11  ;;  %v2064_v49 = vmul.f32 -1.442695, %v291_v32 }
  0xb7   :  { %v171_v27 = vpop.xlane.xlu0 %170  ;;  %v2168_v28 = vpop.eup %2167  ;;  %2185 = vpow2.f32 %v2065_v20  ;;  %v294_v29 = vadd.f32 %v254_v17, %v174_v24  ;;  %v442_v34 = vadd.f32 1.0, %v2166_v22 }
  0xb8   :  { %v2170_v30 = vpop.eup %2169  ;;  %2187 = vrcp.f32 %v446_v23  ;;  %647 = vperm.xlu1 %2140, %v2162_v16   ;;  %v293_v36 = vadd.f32 %v253_v26, %v171_v27  ;;  %v443_v38 = vadd.f32 1.0, %v2168_v28  ;;  %v262_v23 = vld [vmem:[%s3907_s2 + $0xd8] sm:$0xff] }
  0xb9   :  { %v2172_v33 = vpop.eup %2171  ;;  %2189 = vrcp.f32 %v441_v19  ;;  %v2067_v35 = vmul.f32 -1.442695, %v294_v29 }
  0xba   :  { %v448_v37 = vadd.f32 1.0, %v2172_v33  ;;  %v180_v39 = vpop.xlane.xlu1 %179  ;;  %2191 = vpow2.f32 %v2062_v25  ;;  %v2174_v43 = vpop.eup %2173  ;;  %v2066_v52 = vmul.f32 -1.442695, %v293_v36  ;;  %v270_v36 = vld [vmem:[%s3907_s2 + $0x118] sm:$0xff] }
  0xbb   :  { %v177_v42 = vpop.xlane.xlu0 %176  ;;  %2193 = vpow2.f32 %v2067_v35  ;;  %v296_v44 = vadd.f32 %v256_v31, %v180_v39  ;;  %v2176_v47 = vpop.eup %2175 }
  0xbc   :  { %2195 = vrcp.f32 %v448_v37  ;;  %652 = vperm.xlu1 %2140, %v2170_v30   ;;  %v2178_v50 = vpop.eup %2177  ;;  %v295_v56 = vadd.f32 %v255_v45, %v177_v42 }
  0xbd   :  { %2197 = vrcp.f32 %v442_v34  ;;  %v2069_v51 = vmul.f32 -1.442695, %v296_v44  ;;  %v445_v46 = vadd.f32 1.0, %v2178_v50  ;;  %v267_v34 = vld [vmem:[%s3907_s2 + $0x100] sm:$0xff]  ;;  %v261_v50 = vld [vmem:[%s3907_s2 + $0xd0] sm:$0xff] }
  0xbe   :  { %v2180_v54 = vpop.eup %2179  ;;  %2199 = vrcp.f32 %v443_v38  ;;  %v186_v55 = vpop.xlane.xlu1 %185  ;;  %v2068_v63 = vmul.f32 -1.442695, %v295_v56 }
  0xbf   :  { %v183_v59 = vpop.xlane.xlu0 %182  ;;  %v2182_v60 = vpop.eup %2181  ;;  %2201 = vpow2.f32 %v2069_v51  ;;  %v298_v61 = vadd.f32 %v258_v48, %v186_v55  ;;  %682 = vperm.xlu0 %2139, %v2180_v54  }
  0xc0   :  { %v2184_v2 = vpop.eup %2183  ;;  %v450_v1 = vadd.f32 1.0, %v2182_v60  ;;  %657 = vperm.xlu1 %2140, %v2176_v47   ;;  %2203 = vpow2.f32 %v2064_v49  ;;  %v297_v3 = vadd.f32 %v257_v0, %v183_v59 }
  0xc1   :  { %v2186_v58 = vpop.eup %2185  ;;  %v2071_v4 = vmul.f32 -1.442695, %v298_v61  ;;  %2205 = vpow2.f32 %v2066_v52  ;;  %v447_v12 = vadd.f32 1.0, %v2184_v2  ;;  %v264_v52 = vld [vmem:[%s3907_s2 + $0xe8] sm:$0xff] }
  0xc2   :  { %v2188_v62 = vpop.eup %2187  ;;  %2207 = vrcp.f32 %v450_v1  ;;  %v452_v53 = vadd.f32 1.0, %v2186_v58  ;;  %v192_v57 = vpop.xlane.xlu1 %191  ;;  %v2070_v17 = vmul.f32 -1.442695, %v297_v3 }
  0xc3   :  { %v189_v5 = vpop.xlane.xlu0 %188  ;;  %v2190_v6 = vpop.eup %2189  ;;  %2209 = vpow2.f32 %v2071_v4  ;;  %v300_v7 = vadd.f32 %v260_v41, %v192_v57  ;;  %692 = vperm.xlu0 %2139, %v2188_v62   ;;  %v272_v62 = vld [vmem:[%s3907_s2 + $0x128] sm:$0xff] }
  0xc4   :  { %v2192_v9 = vpop.eup %2191  ;;  %2211 = vrcp.f32 %v452_v53  ;;  %662 = vperm.xlu1 %2140, %v2174_v43   ;;  %v299_v18 = vadd.f32 %v259_v8, %v189_v5 }
  0xc5   :  { %v2194_v11 = vpop.eup %2193  ;;  %2213 = vrcp.f32 %v445_v46  ;;  %v2073_v13 = vmul.f32 -1.442695, %v300_v7  ;;  %v449_v25 = vadd.f32 1.0, %v2192_v9  ;;  %v269_v46 = vld [vmem:[%s3907_s2 + $0x110] sm:$0xff] }
  0xc6   :  { %v2196_v14 = vpop.eup %2195  ;;  %v454_v15 = vadd.f32 1.0, %v2194_v11  ;;  %v216_v16 = vpop.xlane.xlu1 %215  ;;  %2215 = vpow2.f32 %v2068_v63  ;;  %v2072_v30 = vmul.f32 -1.442695, %v299_v18  ;;  %v263_v11 = vld [vmem:[%s3907_s2 + $0xe0] sm:$0xff] }
  0xc7   :  { %v213_v19 = vpop.xlane.xlu0 %212  ;;  %v2198_v20 = vpop.eup %2197  ;;  %2217 = vpow2.f32 %v2073_v13  ;;  %v308_v21 = vadd.f32 %v268_v10, %v216_v16  ;;  %702 = vperm.xlu0 %2139, %v2196_v14   ;;  %v266_v14 = vld [vmem:[%s3907_s2 + $0xf8] sm:$0xff] }
  0xc8   :  { %v2200_v22 = vpop.eup %2199  ;;  %2219 = vrcp.f32 %v454_v15  ;;  %667 = vperm.xlu1 %2140, %v2190_v6   ;;  %v307_v45 = vadd.f32 %v267_v34, %v213_v19 }
  0xc9   :  { %v2202_v24 = vpop.eup %2201  ;;  %2221 = vrcp.f32 %v447_v12  ;;  %v2081_v26 = vmul.f32 -1.442695, %v308_v21 }
  0xca   :  { %v2204_v27 = vpop.eup %2203  ;;  %v456_v28 = vadd.f32 1.0, %v2202_v24  ;;  %v198_v29 = vpop.xlane.xlu1 %197  ;;  %2223 = vpow2.f32 %v2070_v17  ;;  %v2080_v0 = vmul.f32 -1.442695, %v307_v45  ;;  %v271_v24 = vld [vmem:[%s3907_s2 + $0x120] sm:$0xff] }
  0xcb   :  { %v195_v31 = vpop.xlane.xlu0 %194  ;;  %v2206_v32 = vpop.eup %2205  ;;  %2225 = vpow2.f32 %v2081_v26  ;;  %v302_v33 = vadd.f32 %v262_v23, %v198_v29  ;;  %v451_v43 = vadd.f32 1.0, %v2204_v27  ;;  %v274_v26 = vld [vmem:[%s3907_s2 + $0x138] sm:$0xff] }
  0xcc   :  { %v2208_v35 = vpop.eup %2207  ;;  %2227 = vrcp.f32 %v456_v28  ;;  %672 = vperm.xlu1 %2140, %v2198_v20   ;;  %v453_v55 = vadd.f32 1.0, %v2206_v32  ;;  %v301_v2 = vadd.f32 %v261_v50, %v195_v31 }
  0xcd   :  { %v2210_v37 = vpop.eup %2209  ;;  %2229 = vrcp.f32 %v449_v25  ;;  %v2075_v38 = vmul.f32 -1.442695, %v302_v33  ;;  %712 = vperm.xlu0 %2139, %v2208_v35  }
  0xce   :  { %v2212_v39 = vpop.eup %2211  ;;  %v458_v42 = vadd.f32 1.0, %v2210_v37  ;;  %v222_v44 = vpop.xlane.xlu1 %221  ;;  %2231 = vpow2.f32 %v2072_v30  ;;  %v2074_v7 = vmul.f32 -1.442695, %v301_v2 }
  0xcf   :  { %v219_v47 = vpop.xlane.xlu0 %218  ;;  %v2214_v48 = vpop.eup %2213  ;;  %2233 = vpow2.f32 %v2075_v38  ;;  %v310_v49 = vadd.f32 %v270_v36, %v222_v44  ;;  %v265_v38 = vld [vmem:[%s3907_s2 + $0xf0] sm:$0xff] }
  0xd0   :  { %v2216_v51 = vpop.eup %2215  ;;  %2235 = vrcp.f32 %v458_v42  ;;  %677 = vperm.xlu1 %2140, %v2200_v22   ;;  %v309_v8 = vadd.f32 %v269_v46, %v219_v47 }
  0xd1   :  { %v2218_v54 = vpop.eup %2217  ;;  %v2083_v56 = vmul.f32 -1.442695, %v310_v49  ;;  %722 = vperm.xlu0 %2139, %v2212_v39   ;;  %2237 = vrcp.f32 %v451_v43  ;;  %v455_v57 = vadd.f32 1.0, %v2216_v51  ;;  %v273_v51 = vld [vmem:[%s3907_s2 + $0x130] sm:$0xff] }
  0xd2   :  { %v2220_v59 = vpop.eup %2219  ;;  %v460_v60 = vadd.f32 1.0, %v2218_v54  ;;  %v204_v61 = vpop.xlane.xlu1 %203  ;;  %v2082_v21 = vmul.f32 -1.442695, %v309_v8 }
  0xd3   :  { %v201_v1 = vpop.xlane.xlu0 %200  ;;  %v2222_v41 = vpop.eup %2221  ;;  %2239 = vpow2.f32 %v2083_v56  ;;  %v304_v58 = vadd.f32 %v264_v52, %v204_v61 }
  0xd4   :  { %v2224_v4 = vpop.eup %2223  ;;  %2241 = vrcp.f32 %v460_v60  ;;  %687 = vperm.xlu1 %2140, %v2214_v48   ;;  %v303_v22 = vadd.f32 %v263_v11, %v201_v1 }
  0xd5   :  { %v2226_v53 = vpop.eup %2225  ;;  %2243 = vrcp.f32 %v453_v55  ;;  %v2077_v63 = vmul.f32 -1.442695, %v304_v58  ;;  %732 = vperm.xlu0 %2139, %v2220_v59   ;;  %v457_v16 = vadd.f32 1.0, %v2224_v4 }
  0xd6   :  { %v2228_v3 = vpop.eup %2227  ;;  %v468_v5 = vadd.f32 1.0, %v2226_v53  ;;  %v228_v6 = vpop.xlane.xlu1 %227  ;;  %2245 = vpow2.f32 %v2080_v0  ;;  %v2076_v34 = vmul.f32 -1.442695, %v303_v22  ;;  %v1846_v22 = vld [vmem:[%s3908_s6 + $0x18] sm:$0xff] }
  0xd7   :  { %v2230_v9 = vpop.eup %2229  ;;  %2247 = vpow2.f32 %v2077_v63  ;;  %v312_v10 = vadd.f32 %v272_v62, %v228_v6  ;;  %v225_v12 = vpop.xlane.xlu0 %224 }
  0xd8   :  { %v2232_v13 = vpop.eup %2231  ;;  %2249 = vrcp.f32 %v468_v5  ;;  %697 = vperm.xlu1 %2140, %v2222_v41   ;;  %v311_v35 = vadd.f32 %v271_v24, %v225_v12  ;;  %v1848_v24 = vld [vmem:[%s3908_s6 + $0x28] sm:$0xff] }
  0xd9   :  { %v2234_v15 = vpop.eup %2233  ;;  %2251 = vrcp.f32 %v455_v57  ;;  %v2085_v17 = vmul.f32 -1.442695, %v312_v10  ;;  %742 = vperm.xlu0 %2139, %v2228_v3   ;;  %v459_v28 = vadd.f32 1.0, %v2232_v13 }
  0xda   :  { %v2236_v18 = vpop.eup %2235  ;;  %v462_v19 = vadd.f32 1.0, %v2234_v15  ;;  %v210_v20 = vpop.xlane.xlu1 %209  ;;  %2253 = vpow2.f32 %v2074_v7  ;;  %v2084_v47 = vmul.f32 -1.442695, %v311_v35  ;;  %v558_v35 = vld [vmem:[%s3910_s3 + $0x18] sm:$0xff] }
  0xdb   :  { %2255 = vpow2.f32 %v2085_v17  ;;  %v306_v23 = vadd.f32 %v266_v14, %v210_v20  ;;  %v2238_v25 = vpop.eup %2237  ;;  %v207_v30 = vpop.xlane.xlu0 %206  ;;  %v1844_v20 = vld [vmem:[%s3908_s6 + $0x8] sm:$0xff] }
  0xdc   :  { %2257 = vrcp.f32 %v462_v19  ;;  %707 = vperm.xlu1 %2140, %v2230_v9   ;;  %v305_v48 = vadd.f32 %v265_v38, %v207_v30  ;;  %v1845_v30 = vld [vmem:[%s3908_s6 + $0x10] sm:$0xff] }
  0xdd   :  { %v2240_v27 = vpop.eup %2239  ;;  %2259 = vrcp.f32 %v457_v16  ;;  %v2079_v29 = vmul.f32 -1.442695, %v306_v23  ;;  %752 = vperm.xlu0 %2139, %v2236_v18  }
  0xde   :  { %v2242_v31 = vpop.eup %2241  ;;  %v470_v32 = vadd.f32 1.0, %v2240_v27  ;;  %v234_v33 = vpop.xlane.xlu1 %233  ;;  %2261 = vpow2.f32 %v2082_v21  ;;  %v2078_v60 = vmul.f32 -1.442695, %v305_v48  ;;  %v956_v27 = vld [vmem:[%s3909_s4 + $0x8] sm:$0xff] }
  0xdf   :  { %v2244_v36 = vpop.eup %2243  ;;  %2263 = vpow2.f32 %v2079_v29  ;;  %v314_v37 = vadd.f32 %v274_v26, %v234_v33  ;;  %v231_v52 = vpop.xlane.xlu0 %230  ;;  %v1843_v26 = vld [vmem:[%s3908_s6] sm:$0xff]  ;;  %v556_v33 = vld [vmem:[%s3910_s3 + $0x8] sm:$0xff] }
  0xe0   :  { %v2246_v39 = vpop.eup %2245  ;;  %2265 = vrcp.f32 %v470_v32  ;;  %717 = vperm.xlu1 %2140, %v2238_v25   ;;  %v313_v61 = vadd.f32 %v273_v51, %v231_v52  ;;  %v1849_v32 = vld [vmem:[%s3908_s6 + $0x30] sm:$0xff]  ;;  %v562_v52 = vld [vmem:[%s3910_s3 + $0x38] sm:$0xff] }
  0xe1   :  { %v2248_v42 = vpop.eup %2247  ;;  %2267 = vrcp.f32 %v459_v28  ;;  %v2087_v43 = vmul.f32 -1.442695, %v314_v37  ;;  %762 = vperm.xlu0 %2139, %v2242_v31   ;;  %v467_v50 = vadd.f32 1.0, %v2246_v39  ;;  %v959_v28 = vld [vmem:[%s3909_s4 + $0x20] sm:$0xff]  ;;  %v557_v37 = vld [vmem:[%s3910_s3 + $0x10] sm:$0xff] }
  0xe2   :  { %v2250_v44 = vpop.eup %2249  ;;  %v464_v45 = vadd.f32 1.0, %v2248_v42  ;;  %2269 = vpow2.f32 %v2076_v34  ;;  %v2086_v4 = vmul.f32 -1.442695, %v313_v61  ;;  %v1016_v29 = vpack.c.bf16 %v959_v28, %v956_v27  ;;  %v1847_v31 = vld [vmem:[%s3908_s6 + $0x20] sm:$0xff]  ;;  %v561_v51 = vld [vmem:[%s3910_s3 + $0x30] sm:$0xff] }
  0xe3   :  { %v2252_v49 = vpop.eup %2251  ;;  %2271 = vpow2.f32 %v2087_v43 }
  0xe4   :  { %v2254_v54 = vpop.eup %2253  ;;  %2273 = vrcp.f32 %v464_v45  ;;  %727 = vperm.xlu1 %2140, %v2244_v36   ;;  %1108 = vmatprep.mubr.bf16.mxu1 %v1016_v29  ;;  %v555_v36 = vld [vmem:[%s3910_s3] sm:$0xff]  ;;  %v577_v29 = vld [vmem:[%s3910_s3 + $0xb0] sm:$0xff] }
  0xe5   :  { %v2256_v55 = vpop.eup %2255  ;;  %802 = vperm.xlu0 %2139, %v2250_v44   ;;  %2275 = vpow2.f32 %v2084_v47  ;;  %v461_v2 = vadd.f32 1.0, %v2254_v54 }
  0xe6   :  { %v2258_v56 = vpop.eup %2257  ;;  %v472_v59 = vadd.f32 1.0, %v2256_v55  ;;  %2277 = vrcp.f32 %v467_v50  ;;  %v560_v50 = vld [vmem:[%s3910_s3 + $0x28] sm:$0xff] }
  0xe7   :  { %v2260_v0 = vpop.eup %2259 }
  0xe8   :  { %v2262_v1 = vpop.eup %2261  ;;  %2279 = vrcp.f32 %v472_v59  ;;  %737 = vperm.xlu1 %2140, %v2252_v49   ;;  %v559_v49 = vld [vmem:[%s3910_s3 + $0x20] sm:$0xff] }
  0xe9   :  { %v2264_v41 = vpop.eup %2263  ;;  %772 = vperm.xlu0 %2139, %v2258_v56   ;;  %2281 = vpow2.f32 %v2078_v60  ;;  %v469_v53 = vadd.f32 1.0, %v2262_v1 }
  0xea   :  { %v2266_v58 = vpop.eup %2265  ;;  %v466_v46 = vadd.f32 1.0, %v2264_v41  ;;  %2283 = vrcp.f32 %v461_v2  ;;  %v563_v41 = vld [vmem:[%s3910_s3 + $0x40] sm:$0xff] }
  0xeb   :  { %v2268_v62 = vpop.eup %2267 }
  0xec   :  { %v2270_v57 = vpop.eup %2269  ;;  %2285 = vrcp.f32 %v466_v46  ;;  %747 = vperm.xlu1 %2140, %v2260_v0   ;;  %v565_v46 = vld [vmem:[%s3910_s3 + $0x50] sm:$0xff] }
  0xed   :  { %v2272_v63 = vpop.eup %2271  ;;  %812 = vperm.xlu0 %2139, %v2266_v58   ;;  %2287 = vpow2.f32 %v2086_v4  ;;  %v463_v6 = vadd.f32 1.0, %v2270_v57  ;;  %v564_v58 = vld [vmem:[%s3910_s3 + $0x48] sm:$0xff]  ;;  %v566_v4 = vld [vmem:[%s3910_s3 + $0x58] sm:$0xff] }
  0xee   :  { %v2274_v3 = vpop.eup %2273  ;;  %v474_v5 = vadd.f32 1.0, %v2272_v63  ;;  %2289 = vrcp.f32 %v469_v53 }
  0xef   :  { %v2276_v7 = vpop.eup %2275 }
  0xf0   :  { %2291 = vrcp.f32 %v474_v5  ;;  %757 = vperm.xlu1 %2140, %v2268_v62   ;;  %v2278_v8 = vpop.eup %2277  ;;  %v471_v10 = vadd.f32 1.0, %v2276_v7 }
  0xf1   :  { %782 = vperm.xlu0 %2139, %v2274_v3   ;;  %2293 = vrcp.f32 %v463_v6 }
  0xf2   :  { %v2280_v9 = vpop.eup %2279  ;;  %2295 = vrcp.f32 %v471_v10  ;;  %v567_v10 = vld [vmem:[%s3910_s3 + $0x60] sm:$0xff] }
  0xf3   :  { %v2282_v11 = vpop.eup %2281 }
  0xf4   :  { %797 = vperm.xlu1 %2140, %v2278_v8   ;;  %v2284_v12 = vpop.eup %2283  ;;  %v465_v14 = vadd.f32 1.0, %v2282_v11  ;;  %v568_v11 = vld [vmem:[%s3910_s3 + $0x68] sm:$0xff] }
  0xf5   :  { %822 = vperm.xlu0 %2139, %v2280_v9  }
  0xf6   :  { %v2286_v13 = vpop.eup %2285  ;;  %2297 = vrcp.f32 %v465_v14 }
  0xf7   :  { %v2288_v15 = vpop.eup %2287 }
  0xf8   :  { %767 = vperm.xlu1 %2140, %v2284_v12   ;;  %v2290_v16 = vpop.eup %2289  ;;  %v473_v18 = vadd.f32 1.0, %v2288_v15  ;;  %v569_v12 = vld [vmem:[%s3910_s3 + $0x70] sm:$0xff] }
  0xf9   :  { %792 = vperm.xlu0 %2139, %v2286_v13   ;;  %v570_v13 = vld [vmem:[%s3910_s3 + $0x78] sm:$0xff]  ;;  %v573_v15 = vld [vmem:[%s3910_s3 + $0x90] sm:$0xff] }
  0xfa   :  { %v2292_v17 = vpop.eup %2291  ;;  %2299 = vrcp.f32 %v473_v18 }
  0xfb   :  { %v2294_v19 = vpop.eup %2293 }
  0xfc   :  { %807 = vperm.xlu1 %2140, %v2290_v16   ;;  %v2296_v21 = vpop.eup %2295 }
  0xfd   :  { %832 = vperm.xlu0 %2139, %v2292_v17  }
 0x100   :  { %777 = vperm.xlu1 %2140, %v2294_v19   ;;  %v2298_v23 = vpop.eup %2297 }
 0x101   :  { %1870 = vperm.xlu0 %2139, %v1844_v20  }
 0x104   :  { %817 = vperm.xlu1 %2140, %v2296_v21   ;;  %v2300_v25 = vpop.eup %2299  ;;  %v574_v21 = vld [vmem:[%s3910_s3 + $0x98] sm:$0xff] }
 0x105   :  { %1880 = vperm.xlu0 %2139, %v1846_v22   ;;  %v571_v22 = vld [vmem:[%s3910_s3 + $0x80] sm:$0xff] }
 0x108   :  { %787 = vperm.xlu1 %2140, %v2298_v23   ;;  %v572_v23 = vld [vmem:[%s3910_s3 + $0x88] sm:$0xff] }
 0x109   :  { %1890 = vperm.xlu0 %2139, %v1848_v24  }
 0x10c   :  { %827 = vperm.xlu1 %2140, %v2300_v25  }
 0x110   :  { %1865 = vperm.xlu1 %2140, %v1843_v26  }
 0x114   :  { %1875 = vperm.xlu1 %2140, %v1845_v30  }
 0x118   :  { %1885 = vperm.xlu1 %2140, %v1847_v31  }
 0x11c   :  { %1895 = vperm.xlu1 %2140, %v1849_v32  }
 0x12f   :  { %v638_v34 = vpop.permute.xlu0 %637 }
 0x130   :  { %v836_v39 = vmul.f32 %v638_v34, %v556_v33  ;;  %v835_v43 = vmul.f32 %v638_v34, %v555_v36  ;;  %v578_v33 = vld [vmem:[%s3910_s3 + $0xb8] sm:$0xff]  ;;  %v575_v34 = vld [vmem:[%s3910_s3 + $0xa0] sm:$0xff] }
 0x133   :  { %v643_v38 = vpop.permute.xlu1 %642 }
 0x134   :  { %v838_v42 = vmul.f32 %v643_v38, %v558_v35  ;;  %v837_v44 = vmul.f32 %v643_v38, %v557_v37  ;;  %v576_v35 = vld [vmem:[%s3910_s3 + $0xa8] sm:$0xff] }
 0x136   :  { %v916_v45 = vpack.c.bf16 %v838_v42, %v836_v39  ;;  %v915_v47 = vpack.c.bf16 %v837_v44, %v835_v43  ;;  %v581_v43 = vld [vmem:[%s3910_s3 + $0xd0] sm:$0xff] }
 0x137   :  { %v648_v48 = vpop.permute.xlu1 %647 }
 0x138   :  { %1076 = vmatprep.subr.bf16.mxu1 %v916_v45  ;;  %v839_v55 = vmul.f32 %v648_v48, %v559_v49  ;;  %v840_v56 = vmul.f32 %v648_v48, %v560_v50  ;;  %v582_v48 = vld [vmem:[%s3910_s3 + $0xd8] sm:$0xff]  ;;  %v579_v49 = vld [vmem:[%s3910_s3 + $0xc0] sm:$0xff]  ;;  %v580_v50 = vld [vmem:[%s3910_s3 + $0xc8] sm:$0xff] }
 0x139   :  { %1077 = vmatpush1.bf16.msra.mxu1 %v915_v47 }
 0x13b   :  { %v653_v54 = vpop.permute.xlu1 %652 }
 0x13c   :  { %v841_v59 = vmul.f32 %v653_v54, %v561_v51  ;;  %v842_v60 = vmul.f32 %v653_v54, %v562_v52 }
 0x13e   :  { %v683_v61 = vpop.permute.xlu0 %682  ;;  %v918_v0 = vpack.c.bf16 %v842_v60, %v840_v56  ;;  %v917_v2 = vpack.c.bf16 %v841_v59, %v839_v55  ;;  %v585_v59 = vld [vmem:[%s3910_s3 + $0xf0] sm:$0xff] }
 0x13f   :  { %v658_v1 = vpop.permute.xlu1 %657  ;;  %v853_v27 = vmul.f32 %v683_v61, %v573_v15  ;;  %v854_v28 = vmul.f32 %v683_v61, %v574_v21 }
 0x140   :  { %1078 = vmatprep.subr.bf16.mxu1 %v918_v0  ;;  %v843_v57 = vmul.f32 %v658_v1, %v563_v41  ;;  %v844_v63 = vmul.f32 %v658_v1, %v564_v58  ;;  %v583_v1 = vld [vmem:[%s3910_s3 + $0xe0] sm:$0xff]  ;;  %v584_v41 = vld [vmem:[%s3910_s3 + $0xe8] sm:$0xff] }
 0x141   :  { %1079 = vmatpush1.bf16.msra.mxu1 %v917_v2  ;;  %v586_v2 = vld [vmem:[%s3910_s3 + $0xf8] sm:$0xff] }
 0x142   :  { %v693_v62 = vpop.permute.xlu0 %692 }
 0x143   :  { %v663_v53 = vpop.permute.xlu1 %662  ;;  %v857_v39 = vmul.f32 %v693_v62, %v577_v29  ;;  %v858_v42 = vmul.f32 %v693_v62, %v578_v33  ;;  %v598_v29 = vld [vmem:[%s3910_s3 + $0x158] sm:$0xff] }
 0x144   :  { %v845_v3 = vmul.f32 %v663_v53, %v565_v46  ;;  %v846_v5 = vmul.f32 %v663_v53, %v566_v4 }
 0x146   :  { %v703_v6 = vpop.permute.xlu0 %702  ;;  %v920_v7 = vpack.c.bf16 %v846_v5, %v844_v63  ;;  %v919_v8 = vpack.c.bf16 %v845_v3, %v843_v57  ;;  %v589_v57 = vld [vmem:[%s3910_s3 + $0x110] sm:$0xff] }
 0x147   :  { %v668_v9 = vpop.permute.xlu1 %667  ;;  %v861_v55 = vmul.f32 %v703_v6, %v581_v43  ;;  %v862_v56 = vmul.f32 %v703_v6, %v582_v48  ;;  %v590_v6 = vld [vmem:[%s3910_s3 + $0x118] sm:$0xff] }
 0x148   :  { %1080 = vmatprep.subr.bf16.mxu1 %v920_v7  ;;  %v847_v16 = vmul.f32 %v668_v9, %v567_v10  ;;  %v848_v17 = vmul.f32 %v668_v9, %v568_v11  ;;  %v587_v7 = vld [vmem:[%s3910_s3 + $0x100] sm:$0xff]  ;;  %v602_v43 = vld [vmem:[%s3910_s3 + $0x178] sm:$0xff] }
 0x149   :  { %1081 = vmatpush1.bf16.msra.mxu1 %v919_v8  ;;  %v588_v8 = vld [vmem:[%s3910_s3 + $0x108] sm:$0xff] }
 0x14b   :  { %v673_v14 = vpop.permute.xlu1 %672 }
 0x14c   :  { %v849_v18 = vmul.f32 %v673_v14, %v569_v12  ;;  %v850_v19 = vmul.f32 %v673_v14, %v570_v13  ;;  %v713_v20 = vpop.permute.xlu0 %712  ;;  %v593_v14 = vld [vmem:[%s3910_s3 + $0x130] sm:$0xff] }
 0x14d   :  { %v865_v62 = vmul.f32 %v713_v20, %v585_v59  ;;  %v866_v53 = vmul.f32 %v713_v20, %v586_v2  ;;  %v592_v20 = vld [vmem:[%s3910_s3 + $0x128] sm:$0xff]  ;;  %v606_v59 = vld [vmem:[%s3910_s3 + $0x198] sm:$0xff] }
 0x14e   :  { %v922_v24 = vpack.c.bf16 %v850_v19, %v848_v17  ;;  %v921_v25 = vpack.c.bf16 %v849_v18, %v847_v16  ;;  %v594_v18 = vld [vmem:[%s3910_s3 + $0x138] sm:$0xff]  ;;  %v591_v19 = vld [vmem:[%s3910_s3 + $0x120] sm:$0xff] }
 0x14f   :  { %v678_v26 = vpop.permute.xlu1 %677 }
 0x150   :  { %v851_v30 = vmul.f32 %v678_v26, %v571_v22  ;;  %v852_v31 = vmul.f32 %v678_v26, %v572_v23  ;;  %v723_v32 = vpop.permute.xlu0 %722  ;;  %1082 = vmatprep.subr.bf16.mxu1 %v922_v24  ;;  %v597_v26 = vld [vmem:[%s3910_s3 + $0x150] sm:$0xff] }
 0x151   :  { %1083 = vmatpush1.bf16.msra.mxu1 %v921_v25  ;;  %v869_v12 = vmul.f32 %v723_v32, %v589_v57  ;;  %v870_v13 = vmul.f32 %v723_v32, %v590_v6  ;;  %v596_v32 = vld [vmem:[%s3910_s3 + $0x148] sm:$0xff] }
 0x152   :  { %v924_v36 = vpack.c.bf16 %v854_v28, %v852_v31  ;;  %v923_v37 = vpack.c.bf16 %v853_v27, %v851_v30  ;;  %v595_v31 = vld [vmem:[%s3910_s3 + $0x140] sm:$0xff] }
 0x153   :  { %v688_v38 = vpop.permute.xlu1 %687 }
 0x154   :  { %v855_v44 = vmul.f32 %v688_v38, %v575_v34  ;;  %v856_v45 = vmul.f32 %v688_v38, %v576_v35  ;;  %v733_v47 = vpop.permute.xlu0 %732  ;;  %1084 = vmatprep.subr.bf16.mxu1 %v924_v36  ;;  %v601_v38 = vld [vmem:[%s3910_s3 + $0x170] sm:$0xff] }
 0x155   :  { %1085 = vmatpush1.bf16.msra.mxu1 %v923_v37  ;;  %v873_v24 = vmul.f32 %v733_v47, %v593_v14  ;;  %v874_v25 = vmul.f32 %v733_v47, %v594_v18  ;;  %v607_v14 = vld [vmem:[%s3910_s3 + $0x1a0] sm:$0xff] }
 0x156   :  { %v926_v51 = vpack.c.bf16 %v858_v42, %v856_v45  ;;  %v925_v52 = vpack.c.bf16 %v857_v39, %v855_v44  ;;  %v599_v44 = vld [vmem:[%s3910_s3 + $0x160] sm:$0xff]  ;;  %v600_v45 = vld [vmem:[%s3910_s3 + $0x168] sm:$0xff] }
 0x157   :  { %v698_v54 = vpop.permute.xlu1 %697 }
 0x158   :  { %v859_v60 = vmul.f32 %v698_v54, %v579_v49  ;;  %v860_v61 = vmul.f32 %v698_v54, %v580_v50  ;;  %v743_v0 = vpop.permute.xlu0 %742  ;;  %1086 = vmatprep.subr.bf16.mxu1 %v926_v51  ;;  %v605_v54 = vld [vmem:[%s3910_s3 + $0x190] sm:$0xff] }
 0x159   :  { %1087 = vmatpush1.bf16.msra.mxu1 %v925_v52  ;;  %v877_v36 = vmul.f32 %v743_v0, %v597_v26  ;;  %v878_v37 = vmul.f32 %v743_v0, %v598_v29  ;;  %v623_v26 = vld [vmem:[%s3910_s3 + $0x220] sm:$0xff] }
 0x15a   :  { %v928_v58 = vpack.c.bf16 %v862_v56, %v860_v61  ;;  %v927_v46 = vpack.c.bf16 %v861_v55, %v859_v60  ;;  %v603_v60 = vld [vmem:[%s3910_s3 + $0x180] sm:$0xff]  ;;  %v604_v61 = vld [vmem:[%s3910_s3 + $0x188] sm:$0xff] }
 0x15b   :  { %v708_v4 = vpop.permute.xlu1 %707 }
 0x15c   :  { %v863_v63 = vmul.f32 %v708_v4, %v583_v1  ;;  %v864_v3 = vmul.f32 %v708_v4, %v584_v41  ;;  %v753_v5 = vpop.permute.xlu0 %752  ;;  %1088 = vmatprep.subr.bf16.mxu1 %v928_v58 }
 0x15d   :  { %1089 = vmatpush1.bf16.msra.mxu1 %v927_v46  ;;  %v881_v51 = vmul.f32 %v753_v5, %v601_v38  ;;  %v882_v52 = vmul.f32 %v753_v5, %v602_v43  ;;  %v621_v46 = vld [vmem:[%s3910_s3 + $0x210] sm:$0xff]  ;;  %v611_v38 = vld [vmem:[%s3910_s3 + $0x1c0] sm:$0xff] }
 0x15e   :  { %v930_v9 = vpack.c.bf16 %v866_v53, %v864_v3  ;;  %v929_v10 = vpack.c.bf16 %v865_v62, %v863_v63  ;;  %v622_v53 = vld [vmem:[%s3910_s3 + $0x218] sm:$0xff]  ;;  %v619_v63 = vld [vmem:[%s3910_s3 + $0x200] sm:$0xff]  ;;  %v620_v3 = vld [vmem:[%s3910_s3 + $0x208] sm:$0xff] }
 0x15f   :  { %v718_v11 = vpop.permute.xlu1 %717 }
 0x160   :  { %v867_v15 = vmul.f32 %v718_v11, %v587_v7  ;;  %v868_v16 = vmul.f32 %v718_v11, %v588_v8  ;;  %v763_v17 = vpop.permute.xlu0 %762  ;;  %1090 = vmatprep.subr.bf16.mxu1 %v930_v9 }
 0x161   :  { %1091 = vmatpush1.bf16.msra.mxu1 %v929_v10  ;;  %v885_v41 = vmul.f32 %v763_v17, %v605_v54  ;;  %v886_v58 = vmul.f32 %v763_v17, %v606_v59  ;;  %v609_v10 = vld [vmem:[%s3910_s3 + $0x1b0] sm:$0xff]  ;;  %v628_v54 = vld [vmem:[%s3910_s3 + $0x248] sm:$0xff] }
 0x162   :  { %v932_v21 = vpack.c.bf16 %v870_v13, %v868_v16  ;;  %v931_v22 = vpack.c.bf16 %v869_v12, %v867_v15  ;;  %v610_v13 = vld [vmem:[%s3910_s3 + $0x1b8] sm:$0xff]  ;;  %v608_v15 = vld [vmem:[%s3910_s3 + $0x1a8] sm:$0xff] }
 0x163   :  { %v728_v23 = vpop.permute.xlu1 %727 }
 0x164   :  { %v871_v27 = vmul.f32 %v728_v23, %v591_v19  ;;  %v872_v28 = vmul.f32 %v728_v23, %v592_v20  ;;  %1092 = vmatprep.subr.bf16.mxu1 %v932_v21  ;;  %v803_v30 = vpop.permute.xlu0 %802 }
 0x165   :  { %1093 = vmatpush1.bf16.msra.mxu1 %v931_v22  ;;  %v901_v8 = vmul.f32 %v803_v30, %v621_v46  ;;  %v902_v9 = vmul.f32 %v803_v30, %v622_v53  ;;  %v625_v22 = vld [vmem:[%s3910_s3 + $0x230] sm:$0xff]  ;;  %v615_v46 = vld [vmem:[%s3910_s3 + $0x1e0] sm:$0xff] }
 0x166   :  { %v934_v33 = vpack.c.bf16 %v874_v25, %v872_v28  ;;  %v933_v34 = vpack.c.bf16 %v873_v24, %v871_v27  ;;  %v626_v25 = vld [vmem:[%s3910_s3 + $0x238] sm:$0xff]  ;;  %v624_v27 = vld [vmem:[%s3910_s3 + $0x228] sm:$0xff] }
 0x167   :  { %v738_v35 = vpop.permute.xlu1 %737 }
 0x168   :  { %v875_v39 = vmul.f32 %v738_v35, %v595_v31  ;;  %v876_v42 = vmul.f32 %v738_v35, %v596_v32  ;;  %1094 = vmatprep.subr.bf16.mxu1 %v934_v33  ;;  %v773_v49 = vpop.permute.xlu0 %772  ;;  %v613_v33 = vld [vmem:[%s3910_s3 + $0x1d0] sm:$0xff] }
 0x169   :  { %1095 = vmatpush1.bf16.msra.mxu1 %v933_v34  ;;  %v889_v20 = vmul.f32 %v773_v49, %v609_v10  ;;  %v890_v21 = vmul.f32 %v773_v49, %v610_v13  ;;  %v634_v10 = vld [vmem:[%s3910_s3 + $0x278] sm:$0xff]  ;;  %v632_v13 = vld [vmem:[%s3910_s3 + $0x268] sm:$0xff] }
 0x16a   :  { %v936_v47 = vpack.c.bf16 %v878_v37, %v876_v42  ;;  %v935_v48 = vpack.c.bf16 %v877_v36, %v875_v39  ;;  %v614_v36 = vld [vmem:[%s3910_s3 + $0x1d8] sm:$0xff]  ;;  %v612_v39 = vld [vmem:[%s3910_s3 + $0x1c8] sm:$0xff] }
 0x16b   :  { %v748_v50 = vpop.permute.xlu1 %747 }
 0x16c   :  { %v879_v55 = vmul.f32 %v748_v50, %v599_v44  ;;  %v880_v56 = vmul.f32 %v748_v50, %v600_v45  ;;  %1096 = vmatprep.subr.bf16.mxu1 %v936_v47  ;;  %v813_v57 = vpop.permute.xlu0 %812 }
 0x16d   :  { %1097 = vmatpush1.bf16.msra.mxu1 %v935_v48  ;;  %v905_v31 = vmul.f32 %v813_v57, %v625_v22  ;;  %v906_v32 = vmul.f32 %v813_v57, %v626_v25  ;;  %v629_v48 = vld [vmem:[%s3910_s3 + $0x250] sm:$0xff]  ;;  %v960_v25 = vld [vmem:[%s3909_s4 + $0x28] sm:$0xff] }
 0x16e   :  { %v937_v0 = vpack.c.bf16 %v881_v51, %v879_v55  ;;  %v938_v2 = vpack.c.bf16 %v882_v52, %v880_v56  ;;  %v630_v51 = vld [vmem:[%s3910_s3 + $0x258] sm:$0xff]  ;;  %v627_v52 = vld [vmem:[%s3910_s3 + $0x240] sm:$0xff] }
 0x16f   :  { %v758_v1 = vpop.permute.xlu1 %757 }
 0x170   :  { %v883_v4 = vmul.f32 %v758_v1, %v603_v60  ;;  %v884_v62 = vmul.f32 %v758_v1, %v604_v61  ;;  %1098 = vmatprep.subr.bf16.mxu1 %v938_v2  ;;  %v783_v18 = vpop.permute.xlu0 %782  ;;  %v617_v2 = vld [vmem:[%s3910_s3 + $0x1f0] sm:$0xff] }
 0x171   :  { %1099 = vmatpush1.bf16.msra.mxu1 %v937_v0  ;;  %v893_v45 = vmul.f32 %v783_v18, %v613_v33  ;;  %v894_v47 = vmul.f32 %v783_v18, %v614_v36  ;;  %v971_v33 = vld [vmem:[%s3909_s4 + $0x80] sm:$0xff]  ;;  %v966_v36 = vld [vmem:[%s3909_s4 + $0x58] sm:$0xff] }
 0x172   :  { %v939_v5 = vpack.c.bf16 %v885_v41, %v883_v4  ;;  %v940_v6 = vpack.c.bf16 %v886_v58, %v884_v62  ;;  %v618_v58 = vld [vmem:[%s3910_s3 + $0x1f8] sm:$0xff]  ;;  %v616_v4 = vld [vmem:[%s3910_s3 + $0x1e8] sm:$0xff] }
 0x173   :  { %v798_v7 = vpop.permute.xlu1 %797 }
 0x174   :  { %v899_v11 = vmul.f32 %v798_v7, %v619_v63  ;;  %v900_v12 = vmul.f32 %v798_v7, %v620_v3  ;;  %1100 = vmatprep.subr.bf16.mxu1 %v940_v6  ;;  %v823_v37 = vpop.permute.xlu0 %822 }
 0x175   :  { %1101 = vmatpush1.bf16.msra.mxu1 %v939_v5  ;;  %v909_v61 = vmul.f32 %v823_v37, %v629_v48  ;;  %v910_v0 = vmul.f32 %v823_v37, %v630_v51  ;;  %v633_v5 = vld [vmem:[%s3910_s3 + $0x270] sm:$0xff]  ;;  %v972_v48 = vld [vmem:[%s3909_s4 + $0x88] sm:$0xff] }
 0x176   :  { %v948_v16 = vpack.c.bf16 %v902_v9, %v900_v12  ;;  %v947_v17 = vpack.c.bf16 %v901_v8, %v899_v11  ;;  %v955_v8 = vld [vmem:[%s3909_s4] sm:$0xff]  ;;  %v958_v9 = vld [vmem:[%s3909_s4 + $0x18] sm:$0xff]  ;;  %v973_v51 = vld [vmem:[%s3909_s4 + $0x90] sm:$0xff] }
 0x177   :  { %v768_v19 = vpop.permute.xlu1 %767  ;;  %v631_v12 = vld [vmem:[%s3910_s3 + $0x260] sm:$0xff] }
 0x178   :  { %v887_v23 = vmul.f32 %v768_v19, %v607_v14  ;;  %v888_v24 = vmul.f32 %v768_v19, %v608_v15  ;;  %1209 = vmatprep.subr.bf16.mxu0 %v948_v16  ;;  %v793_v59 = vpop.permute.xlu0 %792  ;;  %v962_v16 = vld [vmem:[%s3909_s4 + $0x38] sm:$0xff]  ;;  %v1015_v19 = vpack.c.bf16 %v958_v9, %v955_v8  ;;  %v987_v8 = vld [vmem:[%s3909_s4 + $0x100] sm:$0xff] }
 0x179   :  { %1210 = vmatpush1.bf16.msra.mxu0 %v947_v17  ;;  %v897_v63 = vmul.f32 %v793_v59, %v617_v2  ;;  %v898_v3 = vmul.f32 %v793_v59, %v618_v58  ;;  %v965_v17 = vld [vmem:[%s3909_s4 + $0x50] sm:$0xff]  ;;  %v975_v59 = vld [vmem:[%s3909_s4 + $0xa0] sm:$0xff]  ;;  %v990_v9 = vld [vmem:[%s3909_s4 + $0x118] sm:$0xff] }
 0x17a   :  { %v941_v28 = vpack.c.bf16 %v889_v20, %v887_v23  ;;  %v942_v29 = vpack.c.bf16 %v890_v21, %v888_v24  ;;  %v957_v24 = vld [vmem:[%s3909_s4 + $0x10] sm:$0xff]  ;;  %v979_v2 = vld [vmem:[%s3909_s4 + $0xc0] sm:$0xff] }
 0x17b   :  { %v808_v30 = vpop.permute.xlu1 %807  ;;  %v989_v58 = vld [vmem:[%s3909_s4 + $0x110] sm:$0xff] }
 0x17c   :  { %v903_v34 = vmul.f32 %v808_v30, %v623_v26  ;;  %v904_v35 = vmul.f32 %v808_v30, %v624_v27  ;;  %1102 = vmatprep.subr.bf16.mxu1 %v942_v29  ;;  %v833_v11 = vpop.permute.xlu0 %832  ;;  %v1019_v26 = vpack.c.bf16 %v965_v17, %v962_v16  ;;  %v1017_v29 = vpack.c.bf16 %v960_v25, %v957_v24  ;;  %v961_v30 = vld [vmem:[%s3909_s4 + $0x30] sm:$0xff]  ;;  %v1007_v24 = vld [vmem:[%s3909_s4 + $0x1a0] sm:$0xff] }
 0x17d   :  { %1103 = vmatpush1.bf16.msra.mxu1 %v941_v28  ;;  %v913_v20 = vmul.f32 %v833_v11, %v633_v5  ;;  %v914_v21 = vmul.f32 %v833_v11, %v634_v10  ;;  %v992_v5 = vld [vmem:[%s3909_s4 + $0x128] sm:$0xff]  ;;  %v1032_v11 = vpack.c.bf16 %v990_v9, %v987_v8  ;;  %v993_v17 = vld [vmem:[%s3909_s4 + $0x130] sm:$0xff] }
 0x17e   :  { %v949_v42 = vpack.c.bf16 %v905_v31, %v903_v34  ;;  %v950_v43 = vpack.c.bf16 %v906_v32, %v904_v35  ;;  %v964_v31 = vld [vmem:[%s3909_s4 + $0x48] sm:$0xff]  ;;  %v963_v35 = vld [vmem:[%s3909_s4 + $0x40] sm:$0xff] }
 0x17f   :  { %v778_v44 = vpop.permute.xlu1 %777  ;;  %v968_v32 = vld [vmem:[%s3909_s4 + $0x68] sm:$0xff]  ;;  %v1018_v34 = vpack.c.bf16 %v964_v31, %v961_v30  ;;  %v1003_v30 = vld [vmem:[%s3909_s4 + $0x180] sm:$0xff]  ;;  %v1006_v31 = vld [vmem:[%s3909_s4 + $0x198] sm:$0xff] }
 0x180   :  { %v891_v49 = vmul.f32 %v778_v44, %v611_v38  ;;  %v892_v50 = vmul.f32 %v778_v44, %v612_v39  ;;  %1211 = vmatprep.subr.bf16.mxu0 %v950_v43  ;;  %v1022_v37 = vpack.c.bf16 %v971_v33, %v968_v32  ;;  %v1020_v38 = vpack.c.bf16 %v966_v36, %v963_v35  ;;  %v967_v39 = vld [vmem:[%s3909_s4 + $0x60] sm:$0xff]  ;;  %v974_v43 = vld [vmem:[%s3909_s4 + $0x98] sm:$0xff]  ;;  %v977_v44 = vld [vmem:[%s3909_s4 + $0xb0] sm:$0xff] }
 0x181   :  { %1212 = vmatpush1.bf16.msra.mxu0 %v949_v42  ;;  %v970_v42 = vld [vmem:[%s3909_s4 + $0x78] sm:$0xff]  ;;  %v1013_v33 = vld [vmem:[%s3909_s4 + $0x1d0] sm:$0xff]  ;;  %v1008_v36 = vld [vmem:[%s3909_s4 + $0x1a8] sm:$0xff] }
 0x182   :  { %v943_v55 = vpack.c.bf16 %v893_v45, %v891_v49  ;;  %v944_v56 = vpack.c.bf16 %v894_v47, %v892_v50  ;;  %v1021_v45 = vpack.c.bf16 %v970_v42, %v967_v39  ;;  %v969_v47 = vld [vmem:[%s3909_s4 + $0x70] sm:$0xff]  ;;  %v1025_v49 = vpack.c.bf16 %v977_v44, %v974_v43  ;;  %v1010_v32 = vld [vmem:[%s3909_s4 + $0x1b8] sm:$0xff]  ;;  %v1012_v42 = vld [vmem:[%s3909_s4 + $0x1c8] sm:$0xff] }
 0x183   :  { %v818_v60 = vpop.permute.xlu1 %817  ;;  %v1023_v50 = vpack.c.bf16 %v972_v48, %v969_v47  ;;  %v1005_v35 = vld [vmem:[%s3909_s4 + $0x190] sm:$0xff]  ;;  %v1011_v44 = vld [vmem:[%s3909_s4 + $0x1c0] sm:$0xff] }
 0x184   :  { %v907_v1 = vmul.f32 %v818_v60, %v627_v52  ;;  %v908_v41 = vmul.f32 %v818_v60, %v628_v54  ;;  %1104 = vmatprep.subr.bf16.mxu1 %v944_v56  ;;  %v976_v52 = vld [vmem:[%s3909_s4 + $0xa8] sm:$0xff]  ;;  %v978_v60 = vld [vmem:[%s3909_s4 + $0xb8] sm:$0xff]  ;;  %v1009_v39 = vld [vmem:[%s3909_s4 + $0x1b0] sm:$0xff] }
 0x185   :  { %1105 = vmatpush1.bf16.msra.mxu1 %v943_v55  ;;  %v980_v54 = vld [vmem:[%s3909_s4 + $0xc8] sm:$0xff]  ;;  %v983_v55 = vld [vmem:[%s3909_s4 + $0xe0] sm:$0xff]  ;;  %v1024_v56 = vpack.c.bf16 %v976_v52, %v973_v51  ;;  %v1042_v43 = vpack.c.bf16 %v1012_v42, %v1009_v39 }
 0x186   :  { %v951_v62 = vpack.c.bf16 %v909_v61, %v907_v1  ;;  %v952_v53 = vpack.c.bf16 %v910_v0, %v908_v41  ;;  %v1028_v61 = vpack.c.bf16 %v983_v55, %v980_v54  ;;  %v1026_v0 = vpack.c.bf16 %v978_v60, %v975_v59  ;;  %v982_v1 = vld [vmem:[%s3909_s4 + $0xd8] sm:$0xff] }
 0x187   :  { %v788_v57 = vpop.permute.xlu1 %787  ;;  %v986_v41 = vld [vmem:[%s3909_s4 + $0xf8] sm:$0xff] }
 0x188   :  { %v895_v6 = vmul.f32 %v788_v57, %v615_v46  ;;  %v896_v7 = vmul.f32 %v788_v57, %v616_v4  ;;  %1213 = vmatprep.subr.bf16.mxu0 %v952_v53  ;;  %v1027_v46 = vpack.c.bf16 %v982_v1, %v979_v2  ;;  %v981_v4 = vld [vmem:[%s3909_s4 + $0xd0] sm:$0xff]  ;;  %v1031_v53 = vpack.c.bf16 %v989_v58, %v986_v41 }
 0x189   :  { %1214 = vmatpush1.bf16.msra.mxu0 %v951_v62  ;;  %v984_v62 = vld [vmem:[%s3909_s4 + $0xe8] sm:$0xff] }
 0x18a   :  { %v945_v14 = vpack.c.bf16 %v897_v63, %v895_v6  ;;  %v946_v15 = vpack.c.bf16 %v898_v3, %v896_v7  ;;  %v1029_v57 = vpack.c.bf16 %v984_v62, %v981_v4  ;;  %v985_v63 = vld [vmem:[%s3909_s4 + $0xf0] sm:$0xff]  ;;  %v988_v3 = vld [vmem:[%s3909_s4 + $0x108] sm:$0xff]  ;;  %v995_v6 = vld [vmem:[%s3909_s4 + $0x140] sm:$0xff] }
 0x18b   :  { %v828_v18 = vpop.permute.xlu1 %827  ;;  %v1030_v7 = vpack.c.bf16 %v988_v3, %v985_v63  ;;  %v1034_v10 = vpack.c.bf16 %v995_v6, %v992_v5 }
 0x18c   :  { %v911_v22 = vmul.f32 %v828_v18, %v631_v12  ;;  %v912_v23 = vmul.f32 %v828_v18, %v632_v13  ;;  %1106 = vmatprep.subr.bf16.mxu1 %v946_v15  ;;  %v991_v12 = vld [vmem:[%s3909_s4 + $0x120] sm:$0xff]  ;;  %v994_v13 = vld [vmem:[%s3909_s4 + $0x138] sm:$0xff]  ;;  %v1001_v15 = vld [vmem:[%s3909_s4 + $0x170] sm:$0xff] }
 0x18d   :  { %1107 = vmatpush1.bf16.msra.mxu1 %v945_v14  ;;  %v998_v14 = vld [vmem:[%s3909_s4 + $0x158] sm:$0xff]  ;;  %v1033_v16 = vpack.c.bf16 %v994_v13, %v991_v12  ;;  %v996_v18 = vld [vmem:[%s3909_s4 + $0x148] sm:$0xff] }
 0x18e   :  { %v953_v27 = vpack.c.bf16 %v913_v20, %v911_v22  ;;  %v954_v28 = vpack.c.bf16 %v914_v21, %v912_v23  ;;  %v1035_v20 = vpack.c.bf16 %v996_v18, %v993_v17  ;;  %v997_v21 = vld [vmem:[%s3909_s4 + $0x150] sm:$0xff]  ;;  %v1000_v22 = vld [vmem:[%s3909_s4 + $0x168] sm:$0xff] }
 0x18f   :  { %v1004_v23 = vld [vmem:[%s3909_s4 + $0x188] sm:$0xff]  ;;  %v1036_v25 = vpack.c.bf16 %v1000_v22, %v997_v21 }
 0x190   :  { %1215 = vmatprep.subr.bf16.mxu0 %v954_v28  ;;  %1109 = vmatmul.mubr.bf16.vlgmr.msra.gmra.mrb[0].mxu1 %v1015_v19  ;;  %v1037_v19 = vpack.c.bf16 %v1001_v15, %v998_v14  ;;  %v1040_v28 = vpack.c.bf16 %v1007_v24, %v1004_v23 }
 0x191   :  { %1216 = vmatpush1.bf16.msra.mxu0 %v953_v27  ;;  %1118 = vmatprep.mubr.bf16.mxu1 %v1019_v26  ;;  %v999_v26 = vld [vmem:[%s3909_s4 + $0x160] sm:$0xff]  ;;  %v1002_v27 = vld [vmem:[%s3909_s4 + $0x178] sm:$0xff] }
 0x194   :  { %2088 = vmatmul.mubr.msk.bf16.vlgmr.msra.gmra.mrb[0].mxu0 %vm1045_vm1, %v1017_v29  ;;  %v1038_v29 = vpack.c.bf16 %v1002_v27, %v999_v26 }
 0x195   :  { %1251 = vmatprep.mubr.bf16.mxu0 %v2341_v40 }
 0x198   :  { %1119 = vmatmul.mubr.bf16.gmra.mrb[4].mxu1 %v1018_v34  ;;  %v1039_v34 = vpack.c.bf16 %v1006_v31, %v1003_v30 }
 0x199   :  { %1128 = vmatprep.mubr.bf16.mxu1 %v1022_v37  ;;  %v1043_v37 = vpack.c.bf16 %v1013_v33, %v1010_v32 }
 0x19c   :  { %2089 = vmatmul.mubr.msk.bf16.gmra.mrb[4].mxu0 %vm1045_vm1, %v1020_v38  ;;  %v1041_v38 = vpack.c.bf16 %v1008_v36, %v1005_v35 }
 0x19d   :  { %1261 = vmatprep.mubr.bf16.mxu0 %v2341_v40 }
 0x1a0   :  { %1129 = vmatmul.mubr.bf16.gmra.mrb[8].mxu1 %v1021_v45  ;;  %v1014_v45 = vld [vmem:[%s3909_s4 + $0x1d8] sm:$0xff] }
 0x1a1   :  { %1138 = vmatprep.mubr.bf16.mxu1 %v1025_v49  ;;  %v1044_v47 = vpack.c.bf16 %v1014_v45, %v1011_v44 }
 0x1a4   :  { %2090 = vmatmul.mubr.msk.bf16.gmra.mrb[8].mxu0 %vm1045_vm1, %v1023_v50 }
 0x1a5   :  { %1271 = vmatprep.mubr.bf16.mxu0 %v2341_v40 }
 0x1a8   :  { %1139 = vmatmul.mubr.bf16.gmra.mrb[12].mxu1 %v1024_v56 }
 0x1a9   :  { %1148 = vmatprep.mubr.bf16.mxu1 %v1028_v61 }
 0x1ac   :  { %2091 = vmatmul.mubr.msk.bf16.gmra.mrb[12].mxu0 %vm1045_vm1, %v1026_v0 }
 0x1ad   :  { %1281 = vmatprep.mubr.bf16.mxu0 %v2341_v40 }
 0x1b0   :  { %1149 = vmatmul.mubr.bf16.gmra.mrb[16].mxu1 %v1027_v46 }
 0x1b1   :  { %1158 = vmatprep.mubr.bf16.mxu1 %v1031_v53 }
 0x1b4   :  { %2092 = vmatmul.mubr.msk.bf16.gmra.mrb[16].mxu0 %vm1045_vm1, %v1029_v57 }
 0x1b5   :  { %1291 = vmatprep.mubr.bf16.mxu0 %v2341_v40 }
 0x1b8   :  { %1159 = vmatmul.mubr.bf16.gmra.mrb[20].mxu1 %v1030_v7 }
 0x1b9   :  { %1168 = vmatprep.mubr.bf16.mxu1 %v1034_v10 }
 0x1bc   :  { %2093 = vmatmul.mubr.msk.bf16.gmra.mrb[20].mxu0 %vm1045_vm1, %v1032_v11 }
 0x1bd   :  { %1301 = vmatprep.mubr.bf16.mxu0 %v2341_v40 }
 0x1c0   :  { %1169 = vmatmul.mubr.bf16.gmra.mrb[24].mxu1 %v1033_v16 }
 0x1c1   :  { %1178 = vmatprep.mubr.bf16.mxu1 %v1037_v19 }
 0x1c4   :  { %2094 = vmatmul.mubr.msk.bf16.gmra.mrb[24].mxu0 %vm1045_vm1, %v1035_v20 }
 0x1c5   :  { %1311 = vmatprep.mubr.bf16.mxu0 %v2341_v40 }
 0x1c8   :  { %1179 = vmatmul.mubr.bf16.gmra.mrb[28].mxu1 %v1036_v25 }
 0x1c9   :  { %1188 = vmatprep.mubr.bf16.mxu1 %v1040_v28 }
 0x1cc   :  { %2095 = vmatmul.mubr.msk.bf16.gmra.mrb[28].mxu0 %vm1045_vm1, %v1038_v29 }
 0x1cd   :  { %1321 = vmatprep.mubr.bf16.mxu0 %v2341_v40 }
 0x1d0   :  { %1189 = vmatmul.mubr.bf16.gmra.mrb[32].mxu1 %v1039_v34 }
 0x1d1   :  { %1198 = vmatprep.mubr.bf16.mxu1 %v1043_v37 }
 0x1d4   :  { %2096 = vmatmul.mubr.msk.bf16.gmra.mrb[32].mxu0 %vm1045_vm1, %v1041_v38 }
 0x1d5   :  { %1331 = vmatprep.mubr.bf16.mxu0 %v2341_v40 }
 0x1d8   :  { %1199 = vmatmul.mubr.bf16.gmra.mrb[36].mxu1 %v1042_v43 }
 0x1dc   :  { %2097 = vmatmul.mubr.msk.bf16.gmra.mrb[36].mxu0 %vm1045_vm1, %v1044_v47 }
 0x263   :  { %v1110_v48 = vpop.f32.mrb[0].mxu1 }
 0x264   :  { %v1112_v49 = vpop.f32.mrb[1].mxu1 }
 0x265   :  { %v1114_v50 = vpop.f32.mrb[2].mxu1 }
 0x266   :  { %v1116_v51 = vpop.f32.mrb[3].mxu1 }
 0x267   :  { %v1243_v52 = vpop.f32.mrb[0].mxu0 }
 0x268   :  { %v3194_v54 = vadd.f32 %v1243_v52, %v1110_v48  ;;  %v1245_v40 = vpop.f32.mrb[1].mxu0 }
 0x269   :  { %v3196_v55 = vadd.f32 %v1245_v40, %v1112_v49  ;;  %v1247_v56 = vpop.f32.mrb[2].mxu0 }
 0x26a   :  { %v3198_v59 = vadd.f32 %v1247_v56, %v1114_v50  ;;  %v1249_v60 = vpop.f32.mrb[3].mxu0 }
 0x26b   :  { %v3200_v61 = vadd.f32 %v1249_v60, %v1116_v51  ;;  %v1120_v0 = vpop.f32.mrb[4].mxu1  ;;  %v1343_v2 = vsel %vm1342_vm2, %v3196_v55, 0.0 }
 0x26c   :  { %v1122_v1 = vpop.f32.mrb[5].mxu1  ;;  %v1344_v41 = vadd.f32 %v1343_v2, %v3194_v54 }
 0x26d   :  { %v1124_v58 = vpop.f32.mrb[6].mxu1  ;;  %v1347_v46 = vsel %vm1342_vm2, %v3200_v61, 0.0 }
 0x26e   :  { %1345 = vadd.xlane.f32.xlu1 %v1344_v41  ;;  %v1126_v4 = vpop.f32.mrb[7].mxu1  ;;  %v1348_v62 = vadd.f32 %v1347_v46, %v3198_v59 }
 0x26f   :  { %v1253_v53 = vpop.f32.mrb[4].mxu0 }
 0x270   :  { %v3208_v57 = vadd.f32 %v1253_v53, %v1120_v0  ;;  %v1255_v63 = vpop.f32.mrb[5].mxu0  ;;  %1349 = vadd.xlane.f32.xlu0 %v1348_v62 }
 0x271   :  { %v3210_v3 = vadd.f32 %v1255_v63, %v1122_v1  ;;  %v1257_v5 = vpop.f32.mrb[6].mxu0 }
 0x272   :  { %v3212_v6 = vadd.f32 %v1257_v5, %v1124_v58  ;;  %v1259_v7 = vpop.f32.mrb[7].mxu0 }
 0x273   :  { %v3214_v8 = vadd.f32 %v1259_v7, %v1126_v4  ;;  %v1130_v9 = vpop.f32.mrb[8].mxu1  ;;  %v1351_v10 = vsel %vm1342_vm2, %v3210_v3, 0.0 }
 0x274   :  { %v1132_v11 = vpop.f32.mrb[9].mxu1  ;;  %v1352_v12 = vadd.f32 %v1351_v10, %v3208_v57 }
 0x275   :  { %v1134_v13 = vpop.f32.mrb[10].mxu1  ;;  %v1355_v14 = vsel %vm1342_vm2, %v3214_v8, 0.0 }
 0x276   :  { %1353 = vadd.xlane.f32.xlu0 %v1352_v12  ;;  %v1136_v15 = vpop.f32.mrb[11].mxu1  ;;  %v1356_v16 = vadd.f32 %v1355_v14, %v3212_v6 }
 0x277   :  { %v1263_v17 = vpop.f32.mrb[8].mxu0 }
 0x278   :  { %v3222_v18 = vadd.f32 %v1263_v17, %v1130_v9  ;;  %v1265_v19 = vpop.f32.mrb[9].mxu0  ;;  %1357 = vadd.xlane.f32.xlu1 %v1356_v16 }
 0x279   :  { %v3224_v20 = vadd.f32 %v1265_v19, %v1132_v11  ;;  %v1267_v21 = vpop.f32.mrb[10].mxu0 }
 0x27a   :  { %v3226_v22 = vadd.f32 %v1267_v21, %v1134_v13  ;;  %v1269_v23 = vpop.f32.mrb[11].mxu0 }
 0x27b   :  { %v3228_v24 = vadd.f32 %v1269_v23, %v1136_v15  ;;  %v1140_v25 = vpop.f32.mrb[12].mxu1  ;;  %v1359_v26 = vsel %vm1342_vm2, %v3224_v20, 0.0 }
 0x27c   :  { %v1142_v27 = vpop.f32.mrb[13].mxu1  ;;  %v1360_v28 = vadd.f32 %v1359_v26, %v3222_v18 }
 0x27d   :  { %v1363_v29 = vsel %vm1342_vm2, %v3228_v24, 0.0  ;;  %v1144_v30 = vpop.f32.mrb[14].mxu1 }
 0x27e   :  { %v1364_v31 = vadd.f32 %v1363_v29, %v3226_v22  ;;  %1361 = vadd.xlane.f32.xlu0 %v1360_v28  ;;  %v1146_v32 = vpop.f32.mrb[15].mxu1 }
 0x27f   :  { %v1273_v33 = vpop.f32.mrb[12].mxu0 }
 0x280   :  { %v3236_v34 = vadd.f32 %v1273_v33, %v1140_v25  ;;  %v1275_v35 = vpop.f32.mrb[13].mxu0  ;;  %1365 = vadd.xlane.f32.xlu1 %v1364_v31 }
 0x281   :  { %v3238_v36 = vadd.f32 %v1275_v35, %v1142_v27  ;;  %v1277_v37 = vpop.f32.mrb[14].mxu0 }
 0x282   :  { %v3240_v38 = vadd.f32 %v1277_v37, %v1144_v30  ;;  %v1279_v39 = vpop.f32.mrb[15].mxu0 }
 0x283   :  { %v3242_v42 = vadd.f32 %v1279_v39, %v1146_v32  ;;  %v1150_v43 = vpop.f32.mrb[16].mxu1  ;;  %v1367_v44 = vsel %vm1342_vm2, %v3238_v36, 0.0 }
 0x284   :  { %v1152_v45 = vpop.f32.mrb[17].mxu1  ;;  %v1368_v47 = vadd.f32 %v1367_v44, %v3236_v34 }
 0x285   :  { %v1371_v48 = vsel %vm1342_vm2, %v3242_v42, 0.0  ;;  %v1154_v49 = vpop.f32.mrb[18].mxu1 }
 0x286   :  { %v1372_v50 = vadd.f32 %v1371_v48, %v3240_v38  ;;  %1369 = vadd.xlane.f32.xlu0 %v1368_v47  ;;  %v1156_v51 = vpop.f32.mrb[19].mxu1 }
 0x287   :  { %v1283_v52 = vpop.f32.mrb[16].mxu0 }
 0x288   :  { %v3250_v40 = vadd.f32 %v1283_v52, %v1150_v43  ;;  %v1285_v56 = vpop.f32.mrb[17].mxu0  ;;  %1373 = vadd.xlane.f32.xlu1 %v1372_v50 }
 0x289   :  { %v3252_v60 = vadd.f32 %v1285_v56, %v1152_v45  ;;  %v1287_v0 = vpop.f32.mrb[18].mxu0 }
 0x28a   :  { %v3254_v2 = vadd.f32 %v1287_v0, %v1154_v49  ;;  %v1289_v1 = vpop.f32.mrb[19].mxu0 }
 0x28b   :  { %v3256_v41 = vadd.f32 %v1289_v1, %v1156_v51  ;;  %v1160_v58 = vpop.f32.mrb[20].mxu1  ;;  %v1375_v46 = vsel %vm1342_vm2, %v3252_v60, 0.0 }
 0x28c   :  { %v1162_v4 = vpop.f32.mrb[21].mxu1  ;;  %v1376_v62 = vadd.f32 %v1375_v46, %v3250_v40 }
 0x28d   :  { %v1379_v53 = vsel %vm1342_vm2, %v3256_v41, 0.0  ;;  %v1164_v63 = vpop.f32.mrb[22].mxu1 }
 0x28e   :  { %v1380_v5 = vadd.f32 %v1379_v53, %v3254_v2  ;;  %1377 = vadd.xlane.f32.xlu0 %v1376_v62  ;;  %v1166_v7 = vpop.f32.mrb[23].mxu1 }
 0x28f   :  { %v1293_v9 = vpop.f32.mrb[20].mxu0 }
 0x290   :  { %v3264_v10 = vadd.f32 %v1293_v9, %v1160_v58  ;;  %v1295_v11 = vpop.f32.mrb[21].mxu0  ;;  %1381 = vadd.xlane.f32.xlu1 %v1380_v5 }
 0x291   :  { %v3266_v12 = vadd.f32 %v1295_v11, %v1162_v4  ;;  %v1297_v13 = vpop.f32.mrb[22].mxu0 }
 0x292   :  { %v3268_v14 = vadd.f32 %v1297_v13, %v1164_v63  ;;  %v1299_v15 = vpop.f32.mrb[23].mxu0 }
 0x293   :  { %v3270_v16 = vadd.f32 %v1299_v15, %v1166_v7  ;;  %v1170_v17 = vpop.f32.mrb[24].mxu1  ;;  %v1383_v19 = vsel %vm1342_vm2, %v3266_v12, 0.0 }
 0x294   :  { %v1172_v21 = vpop.f32.mrb[25].mxu1  ;;  %v1384_v23 = vadd.f32 %v1383_v19, %v3264_v10 }
 0x295   :  { %v1387_v25 = vsel %vm1342_vm2, %v3270_v16, 0.0  ;;  %v1174_v26 = vpop.f32.mrb[26].mxu1 }
 0x296   :  { %v1388_v27 = vadd.f32 %v1387_v25, %v3268_v14  ;;  %1385 = vadd.xlane.f32.xlu0 %v1384_v23  ;;  %v1176_v28 = vpop.f32.mrb[27].mxu1 }
 0x297   :  { %v1303_v29 = vpop.f32.mrb[24].mxu0 }
 0x298   :  { %v3278_v30 = vadd.f32 %v1303_v29, %v1170_v17  ;;  %v1305_v31 = vpop.f32.mrb[25].mxu0  ;;  %1389 = vadd.xlane.f32.xlu1 %v1388_v27 }
 0x299   :  { %v3280_v32 = vadd.f32 %v1305_v31, %v1172_v21  ;;  %v1307_v33 = vpop.f32.mrb[26].mxu0 }
 0x29a   :  { %v3282_v35 = vadd.f32 %v1307_v33, %v1174_v26  ;;  %v1309_v37 = vpop.f32.mrb[27].mxu0 }
 0x29b   :  { %v3284_v39 = vadd.f32 %v1309_v37, %v1176_v28  ;;  %v1180_v43 = vpop.f32.mrb[28].mxu1  ;;  %v1391_v44 = vsel %vm1342_vm2, %v3280_v32, 0.0 }
 0x29c   :  { %v1182_v45 = vpop.f32.mrb[29].mxu1  ;;  %v1392_v47 = vadd.f32 %v1391_v44, %v3278_v30 }
 0x29d   :  { %v1395_v48 = vsel %vm1342_vm2, %v3284_v39, 0.0  ;;  %v1184_v49 = vpop.f32.mrb[30].mxu1 }
 0x29e   :  { %v1396_v50 = vadd.f32 %v1395_v48, %v3282_v35  ;;  %1393 = vadd.xlane.f32.xlu0 %v1392_v47  ;;  %v1186_v51 = vpop.f32.mrb[31].mxu1 }
 0x29f   :  { %v1313_v52 = vpop.f32.mrb[28].mxu0 }
 0x2a0   :  { %v3292_v56 = vadd.f32 %v1313_v52, %v1180_v43  ;;  %v1315_v0 = vpop.f32.mrb[29].mxu0  ;;  %1397 = vadd.xlane.f32.xlu1 %v1396_v50 }
 0x2a1   :  { %v3294_v1 = vadd.f32 %v1315_v0, %v1182_v45  ;;  %v1317_v58 = vpop.f32.mrb[30].mxu0 }
 0x2a2   :  { %v3296_v46 = vadd.f32 %v1317_v58, %v1184_v49  ;;  %v1319_v4 = vpop.f32.mrb[31].mxu0 }
 0x2a3   :  { %v3298_v62 = vadd.f32 %v1319_v4, %v1186_v51  ;;  %v1190_v53 = vpop.f32.mrb[32].mxu1  ;;  %v1399_v63 = vsel %vm1342_vm2, %v3294_v1, 0.0 }
 0x2a4   :  { %v1192_v5 = vpop.f32.mrb[33].mxu1  ;;  %v1400_v7 = vadd.f32 %v1399_v63, %v3292_v56 }
 0x2a5   :  { %v1403_v9 = vsel %vm1342_vm2, %v3298_v62, 0.0  ;;  %v1194_v11 = vpop.f32.mrb[34].mxu1 }
 0x2a6   :  { %v1404_v13 = vadd.f32 %v1403_v9, %v3296_v46  ;;  %1401 = vadd.xlane.f32.xlu0 %v1400_v7  ;;  %v1196_v15 = vpop.f32.mrb[35].mxu1  ;;  %v1851_v9 = vld [vmem:[%s3908_s6 + $0x40] sm:$0xff] }
 0x2a7   :  { %v1323_v17 = vpop.f32.mrb[32].mxu0 }
 0x2a8   :  { %v3306_v19 = vadd.f32 %v1323_v17, %v1190_v53  ;;  %v1325_v21 = vpop.f32.mrb[33].mxu0  ;;  %1405 = vadd.xlane.f32.xlu1 %v1404_v13  ;;  %v3340_v13 = vpop.permute.xlu1 %1865 }
 0x2a9   :  { %v3308_v23 = vadd.f32 %v1325_v21, %v1192_v5  ;;  %v1327_v25 = vpop.f32.mrb[34].mxu0  ;;  %v3344_v17 = vpop.permute.xlu0 %1870 }
 0x2aa   :  { %v3310_v26 = vadd.f32 %v1327_v25, %v1194_v11  ;;  %v1329_v27 = vpop.f32.mrb[35].mxu0  ;;  %v1850_v11 = vld [vmem:[%s3908_s6 + $0x38] sm:$0xff] }
 0x2ab   :  { %v3312_v28 = vadd.f32 %v1329_v27, %v1196_v15  ;;  %v1200_v29 = vpop.f32.mrb[36].mxu1  ;;  %v1407_v31 = vsel %vm1342_vm2, %v3308_v23, 0.0 }
 0x2ac   :  { %v1202_v33 = vpop.f32.mrb[37].mxu1  ;;  %v1408_v37 = vadd.f32 %v1407_v31, %v3306_v19  ;;  %v3342_v15 = vpop.permute.xlu1 %1875 }
 0x2ad   :  { %v1411_v43 = vsel %vm1342_vm2, %v3312_v28, 0.0  ;;  %v1204_v44 = vpop.f32.mrb[38].mxu1  ;;  %v3348_v25 = vpop.permute.xlu0 %1880 }
 0x2ae   :  { %v1412_v45 = vadd.f32 %v1411_v43, %v3310_v26  ;;  %1409 = vadd.xlane.f32.xlu0 %v1408_v37  ;;  %v1206_v47 = vpop.f32.mrb[39].mxu1 }
 0x2af   :  { %v1333_v48 = vpop.f32.mrb[36].mxu0 }
 0x2b0   :  { %v3320_v49 = vadd.f32 %v1333_v48, %v1200_v29  ;;  %v1335_v50 = vpop.f32.mrb[37].mxu0  ;;  %1413 = vadd.xlane.f32.xlu1 %v1412_v45  ;;  %v3346_v21 = vpop.permute.xlu1 %1885 }
 0x2b1   :  { %v3322_v51 = vadd.f32 %v1335_v50, %v1202_v33  ;;  %v1337_v52 = vpop.f32.mrb[38].mxu0  ;;  %v3352_v29 = vpop.permute.xlu0 %1890 }
 0x2b2   :  { %v3324_v0 = vadd.f32 %v1337_v52, %v1204_v44  ;;  %v1339_v58 = vpop.f32.mrb[39].mxu0 }
 0x2b3   :  { %v1415_v4 = vsel %vm1342_vm2, %v3322_v51, 0.0  ;;  %v3328_v53 = vadd.f32 %v1339_v58, %v1206_v47 }
 0x2b4   :  { %v1416_v63 = vadd.f32 %v1415_v4, %v3320_v49  ;;  %v3350_v27 = vpop.permute.xlu1 %1895 }
 0x2b5   :  { %v1419_v5 = vsel %vm1342_vm2, %v3328_v53, 0.0 }
 0x2b6   :  { %v1420_v7 = vadd.f32 %v1419_v5, %v3324_v0  ;;  %1417 = vadd.xlane.f32.xlu0 %v1416_v63 }
 0x2b8   :  { %1421 = vadd.xlane.f32.xlu1 %v1420_v7 }
 0x2c9   :  { %1905 = vperm.xlu1 %2140, %v1851_v9  }
 0x2cc   :  { %1900 = vperm.xlu0 %2139, %v1850_v11  }
 0x2fb   :  { %v1346_v31 = vpop.xlane.xlu1 %1345 }
 0x2fc   :  { %v1423_v33 = vmul.f32 0.0051020407, %v1346_v31 }
 0x2fd   :  { %v1350_v37 = vpop.xlane.xlu0 %1349 }
 0x2fe   :  { %v3355_v43 = vsub.f32 %v3194_v54, %v1423_v33  ;;  %v3358_v44 = vsub.f32 %v3196_v55, %v1423_v33  ;;  %v1424_v45 = vmul.f32 0.0051020407, %v1350_v37 }
 0x300   :  { %v1483_v47 = vmul.f32 %v3355_v43, %v3355_v43  ;;  %v1484_v48 = vmul.f32 %v3358_v44, %v3358_v44  ;;  %v3365_v50 = vsub.f32 %v3198_v59, %v1424_v45  ;;  %v3368_v52 = vsub.f32 %v3200_v61, %v1424_v45 }
 0x302   :  { %v1485_v54 = vmul.f32 %v3365_v50, %v3365_v50  ;;  %v1486_v55 = vmul.f32 %v3368_v52, %v3368_v52  ;;  %v1523_v58 = vsel %vm1342_vm2, %v1484_v48, 0.0 }
 0x303   :  { %v1354_v4 = vpop.xlane.xlu0 %1353  ;;  %v1524_v63 = vadd.f32 %v1523_v58, %v1483_v47 }
 0x304   :  { %v1425_v5 = vmul.f32 0.0051020407, %v1354_v4  ;;  %v1527_v7 = vsel %vm1342_vm2, %v1486_v55, 0.0 }
 0x305   :  { %1525 = vadd.xlane.f32.xlu0 %v1524_v63  ;;  %v1358_v9 = vpop.xlane.xlu1 %1357  ;;  %v1528_v59 = vadd.f32 %v1527_v7, %v1485_v54 }
 0x306   :  { %v3377_v11 = vsub.f32 %v3208_v57, %v1425_v5  ;;  %v3380_v61 = vsub.f32 %v3210_v3, %v1425_v5  ;;  %v1426_v31 = vmul.f32 0.0051020407, %v1358_v9 }
 0x307   :  { %1529 = vadd.xlane.f32.xlu1 %v1528_v59 }
 0x308   :  { %v1487_v33 = vmul.f32 %v3377_v11, %v3377_v11  ;;  %v1488_v37 = vmul.f32 %v3380_v61, %v3380_v61  ;;  %v3387_v45 = vsub.f32 %v3212_v6, %v1426_v31  ;;  %v3390_v47 = vsub.f32 %v3214_v8, %v1426_v31 }
 0x30a   :  { %v1489_v57 = vmul.f32 %v3387_v45, %v3387_v45  ;;  %v1490_v3 = vmul.f32 %v3390_v47, %v3390_v47  ;;  %v1531_v48 = vsel %vm1342_vm2, %v1488_v37, 0.0 }
 0x30b   :  { %v1362_v54 = vpop.xlane.xlu0 %1361  ;;  %v1532_v55 = vadd.f32 %v1531_v48, %v1487_v33 }
 0x30c   :  { %v1427_v58 = vmul.f32 0.0051020407, %v1362_v54  ;;  %v1535_v4 = vsel %vm1342_vm2, %v1490_v3, 0.0 }
 0x30d   :  { %v1366_v63 = vpop.xlane.xlu1 %1365  ;;  %1533 = vadd.xlane.f32.xlu0 %v1532_v55  ;;  %v1536_v6 = vadd.f32 %v1535_v4, %v1489_v57 }
 0x30e   :  { %v3399_v5 = vsub.f32 %v3222_v18, %v1427_v58  ;;  %v3402_v8 = vsub.f32 %v3224_v20, %v1427_v58  ;;  %v1428_v7 = vmul.f32 0.0051020407, %v1366_v63 }
 0x30f   :  { %1537 = vadd.xlane.f32.xlu1 %v1536_v6 }
 0x310   :  { %v1491_v9 = vmul.f32 %v3399_v5, %v3399_v5  ;;  %v1492_v59 = vmul.f32 %v3402_v8, %v3402_v8  ;;  %v3409_v31 = vsub.f32 %v3226_v22, %v1428_v7  ;;  %v3412_v33 = vsub.f32 %v3228_v24, %v1428_v7 }
 0x312   :  { %v1493_v18 = vmul.f32 %v3409_v31, %v3409_v31  ;;  %v1494_v20 = vmul.f32 %v3412_v33, %v3412_v33  ;;  %v1539_v37 = vsel %vm1342_vm2, %v1492_v59, 0.0 }
 0x313   :  { %v1370_v57 = vpop.xlane.xlu0 %1369  ;;  %v1540_v3 = vadd.f32 %v1539_v37, %v1491_v9 }
 0x314   :  { %v1429_v48 = vmul.f32 0.0051020407, %v1370_v57  ;;  %v1543_v54 = vsel %vm1342_vm2, %v1494_v20, 0.0 }
 0x315   :  { %v1374_v55 = vpop.xlane.xlu1 %1373  ;;  %1541 = vadd.xlane.f32.xlu0 %v1540_v3  ;;  %v1544_v22 = vadd.f32 %v1543_v54, %v1493_v18 }
 0x316   :  { %v3421_v58 = vsub.f32 %v3236_v34, %v1429_v48  ;;  %v3424_v24 = vsub.f32 %v3238_v36, %v1429_v48  ;;  %v1430_v4 = vmul.f32 0.0051020407, %v1374_v55 }
 0x317   :  { %1545 = vadd.xlane.f32.xlu1 %v1544_v22 }
 0x318   :  { %v1495_v63 = vmul.f32 %v3421_v58, %v3421_v58  ;;  %v1496_v6 = vmul.f32 %v3424_v24, %v3424_v24  ;;  %v3431_v7 = vsub.f32 %v3240_v38, %v1430_v4  ;;  %v3434_v9 = vsub.f32 %v3242_v42, %v1430_v4 }
 0x31a   :  { %v1497_v34 = vmul.f32 %v3431_v7, %v3431_v7  ;;  %v1498_v36 = vmul.f32 %v3434_v9, %v3434_v9  ;;  %v1547_v59 = vsel %vm1342_vm2, %v1496_v6, 0.0 }
 0x31b   :  { %v1378_v18 = vpop.xlane.xlu0 %1377  ;;  %v1548_v20 = vadd.f32 %v1547_v59, %v1495_v63 }
 0x31c   :  { %v1431_v37 = vmul.f32 0.0051020407, %v1378_v18  ;;  %v1551_v57 = vsel %vm1342_vm2, %v1498_v36, 0.0 }
 0x31d   :  { %v1382_v3 = vpop.xlane.xlu1 %1381  ;;  %1549 = vadd.xlane.f32.xlu0 %v1548_v20  ;;  %v1552_v38 = vadd.f32 %v1551_v57, %v1497_v34 }
 0x31e   :  { %v3443_v48 = vsub.f32 %v3250_v40, %v1431_v37  ;;  %v3446_v42 = vsub.f32 %v3252_v60, %v1431_v37  ;;  %v1432_v54 = vmul.f32 0.0051020407, %v1382_v3 }
 0x31f   :  { %1553 = vadd.xlane.f32.xlu1 %v1552_v38 }
 0x320   :  { %v1499_v55 = vmul.f32 %v3443_v48, %v3443_v48  ;;  %v1500_v22 = vmul.f32 %v3446_v42, %v3446_v42  ;;  %v3453_v4 = vsub.f32 %v3254_v2, %v1432_v54  ;;  %v3456_v63 = vsub.f32 %v3256_v41, %v1432_v54 }
 0x322   :  { %v1501_v40 = vmul.f32 %v3453_v4, %v3453_v4  ;;  %v1502_v60 = vmul.f32 %v3456_v63, %v3456_v63  ;;  %v1555_v6 = vsel %vm1342_vm2, %v1500_v22, 0.0 }
 0x323   :  { %v1386_v34 = vpop.xlane.xlu0 %1385  ;;  %v1556_v36 = vadd.f32 %v1555_v6, %v1499_v55 }
 0x324   :  { %v1433_v59 = vmul.f32 0.0051020407, %v1386_v34  ;;  %v1559_v18 = vsel %vm1342_vm2, %v1502_v60, 0.0 }
 0x325   :  { %v1390_v20 = vpop.xlane.xlu1 %1389  ;;  %1557 = vadd.xlane.f32.xlu0 %v1556_v36  ;;  %v1560_v2 = vadd.f32 %v1559_v18, %v1501_v40 }
 0x326   :  { %v3465_v37 = vsub.f32 %v3264_v10, %v1433_v59  ;;  %v3468_v41 = vsub.f32 %v3266_v12, %v1433_v59  ;;  %v1434_v57 = vmul.f32 0.0051020407, %v1390_v20 }
 0x327   :  { %1561 = vadd.xlane.f32.xlu1 %v1560_v2 }
 0x328   :  { %v1503_v3 = vmul.f32 %v3465_v37, %v3465_v37  ;;  %v1504_v38 = vmul.f32 %v3468_v41, %v3468_v41  ;;  %v3475_v54 = vsub.f32 %v3268_v14, %v1434_v57  ;;  %v3478_v55 = vsub.f32 %v3270_v16, %v1434_v57 }
 0x32a   :  { %v1505_v10 = vmul.f32 %v3475_v54, %v3475_v54  ;;  %v1506_v12 = vmul.f32 %v3478_v55, %v3478_v55  ;;  %v1563_v22 = vsel %vm1342_vm2, %v1504_v38, 0.0 }
 0x32b   :  { %v1394_v40 = vpop.xlane.xlu0 %1393  ;;  %v1564_v60 = vadd.f32 %v1563_v22, %v1503_v3 }
 0x32c   :  { %v1435_v6 = vmul.f32 0.0051020407, %v1394_v40  ;;  %v1567_v34 = vsel %vm1342_vm2, %v1506_v12, 0.0 }
 0x32d   :  { %v1398_v36 = vpop.xlane.xlu1 %1397  ;;  %1565 = vadd.xlane.f32.xlu0 %v1564_v60  ;;  %v1568_v14 = vadd.f32 %v1567_v34, %v1505_v10 }
 0x32e   :  { %v3487_v59 = vsub.f32 %v3278_v30, %v1435_v6  ;;  %v3490_v16 = vsub.f32 %v3280_v32, %v1435_v6  ;;  %v1436_v18 = vmul.f32 0.0051020407, %v1398_v36 }
 0x32f   :  { %1569 = vadd.xlane.f32.xlu1 %v1568_v14 }
 0x330   :  { %v1507_v20 = vmul.f32 %v3487_v59, %v3487_v59  ;;  %v1508_v2 = vmul.f32 %v3490_v16, %v3490_v16  ;;  %v3497_v57 = vsub.f32 %v3282_v35, %v1436_v18  ;;  %v3500_v3 = vsub.f32 %v3284_v39, %v1436_v18 }
 0x332   :  { %v1509_v30 = vmul.f32 %v3497_v57, %v3497_v57  ;;  %v1510_v32 = vmul.f32 %v3500_v3, %v3500_v3  ;;  %v1571_v38 = vsel %vm1342_vm2, %v1508_v2, 0.0 }
 0x333   :  { %v1402_v10 = vpop.xlane.xlu0 %1401  ;;  %v1572_v12 = vadd.f32 %v1571_v38, %v1507_v20 }
 0x334   :  { %v1437_v22 = vmul.f32 0.0051020407, %v1402_v10  ;;  %v1575_v40 = vsel %vm1342_vm2, %v1510_v32, 0.0 }
 0x335   :  { %v1406_v60 = vpop.xlane.xlu1 %1405  ;;  %1573 = vadd.xlane.f32.xlu0 %v1572_v12  ;;  %v1576_v35 = vadd.f32 %v1575_v40, %v1509_v30 }
 0x336   :  { %v3509_v6 = vsub.f32 %v3292_v56, %v1437_v22  ;;  %v3512_v39 = vsub.f32 %v3294_v1, %v1437_v22  ;;  %v1438_v34 = vmul.f32 0.0051020407, %v1406_v60 }
 0x337   :  { %1577 = vadd.xlane.f32.xlu1 %v1576_v35 }
 0x338   :  { %v1511_v36 = vmul.f32 %v3509_v6, %v3509_v6  ;;  %v1512_v14 = vmul.f32 %v3512_v39, %v3512_v39  ;;  %v3519_v18 = vsub.f32 %v3296_v46, %v1438_v34  ;;  %v3522_v20 = vsub.f32 %v3298_v62, %v1438_v34 }
 0x33a   :  { %v1513_v56 = vmul.f32 %v3519_v18, %v3519_v18  ;;  %v1514_v1 = vmul.f32 %v3522_v20, %v3522_v20  ;;  %v1579_v2 = vsel %vm1342_vm2, %v1512_v14, 0.0 }
 0x33b   :  { %v1410_v30 = vpop.xlane.xlu0 %1409  ;;  %v1580_v32 = vadd.f32 %v1579_v2, %v1511_v36 }
 0x33c   :  { %v1439_v38 = vmul.f32 0.0051020407, %v1410_v30  ;;  %v1583_v10 = vsel %vm1342_vm2, %v1514_v1, 0.0 }
 0x33d   :  { %v1414_v12 = vpop.xlane.xlu1 %1413  ;;  %1581 = vadd.xlane.f32.xlu0 %v1580_v32  ;;  %v1584_v46 = vadd.f32 %v1583_v10, %v1513_v56 }
 0x33e   :  { %v3531_v22 = vsub.f32 %v3306_v19, %v1439_v38  ;;  %v3534_v62 = vsub.f32 %v3308_v23, %v1439_v38  ;;  %v1440_v40 = vmul.f32 0.0051020407, %v1414_v12 }
 0x33f   :  { %1585 = vadd.xlane.f32.xlu1 %v1584_v46 }
 0x340   :  { %v1515_v60 = vmul.f32 %v3531_v22, %v3531_v22  ;;  %v1516_v35 = vmul.f32 %v3534_v62, %v3534_v62  ;;  %v3541_v34 = vsub.f32 %v3310_v26, %v1440_v40  ;;  %v3544_v36 = vsub.f32 %v3312_v28, %v1440_v40 }
 0x342   :  { %v1517_v19 = vmul.f32 %v3541_v34, %v3541_v34  ;;  %v1518_v23 = vmul.f32 %v3544_v36, %v3544_v36  ;;  %v1587_v14 = vsel %vm1342_vm2, %v1516_v35, 0.0 }
 0x343   :  { %v1418_v56 = vpop.xlane.xlu0 %1417  ;;  %v1588_v1 = vadd.f32 %v1587_v14, %v1515_v60 }
 0x344   :  { %v1441_v2 = vmul.f32 0.0051020407, %v1418_v56  ;;  %v1591_v30 = vsel %vm1342_vm2, %v1518_v23, 0.0  ;;  %v1855_v56 = vld [vmem:[%s3908_s6 + $0x60] sm:$0xff] }
 0x345   :  { %v1422_v32 = vpop.xlane.xlu1 %1421  ;;  %1589 = vadd.xlane.f32.xlu0 %v1588_v1  ;;  %v1592_v26 = vadd.f32 %v1591_v30, %v1517_v19  ;;  %v1854_v1 = vld [vmem:[%s3908_s6 + $0x58] sm:$0xff]  ;;  %v1856_v30 = vld [vmem:[%s3908_s6 + $0x68] sm:$0xff] }
 0x346   :  { %v3553_v38 = vsub.f32 %v3320_v49, %v1441_v2  ;;  %v3556_v28 = vsub.f32 %v3322_v51, %v1441_v2  ;;  %v1442_v10 = vmul.f32 0.0051020407, %v1422_v32  ;;  %v1857_v2 = vld [vmem:[%s3908_s6 + $0x70] sm:$0xff]  ;;  %v1859_v32 = vld [vmem:[%s3908_s6 + $0x80] sm:$0xff] }
 0x347   :  { %1593 = vadd.xlane.f32.xlu1 %v1592_v26  ;;  %v1858_v26 = vld [vmem:[%s3908_s6 + $0x78] sm:$0xff] }
 0x348   :  { %v1519_v12 = vmul.f32 %v3553_v38, %v3553_v38  ;;  %v1520_v46 = vmul.f32 %v3556_v28, %v3556_v28  ;;  %v3563_v40 = vsub.f32 %v3324_v0, %v1442_v10  ;;  %v3566_v60 = vsub.f32 %v3328_v53, %v1442_v10  ;;  %v1853_v0 = vld [vmem:[%s3908_s6 + $0x50] sm:$0xff]  ;;  %v1852_v53 = vld [vmem:[%s3908_s6 + $0x48] sm:$0xff] }
 0x349   :  { %v1860_v10 = vld [vmem:[%s3908_s6 + $0x88] sm:$0xff] }
 0x34a   :  { %3915 = vst [vmem:[#allocation2_spill] sm:$0xff] %v3563_v40  ;;  %3916 = vst [vmem:[#allocation3_spill] sm:$0xff] %v3566_v60  ;;  %v1521_v49 = vmul.f32 %v3563_v40, %v3563_v40  ;;  %v1522_v51 = vmul.f32 %v3566_v60, %v3566_v60  ;;  %v1595_v35 = vsel %vm1342_vm2, %v1520_v46, 0.0  ;;  %v3603_v46 = vpop.permute.xlu1 %1905 }
 0x34b   :  { %v1596_v19 = vadd.f32 %v1595_v35, %v1519_v12  ;;  %v3601_v12 = vpop.permute.xlu0 %1900 }
 0x34c   :  { %v1599_v23 = vsel %vm1342_vm2, %v1522_v51, 0.0 }
 0x34d   :  { %1597 = vadd.xlane.f32.xlu0 %v1596_v19  ;;  %v1600_v14 = vadd.f32 %v1599_v23, %v1521_v49 }
 0x34f   :  { %1601 = vadd.xlane.f32.xlu1 %v1600_v14 }
 0x360   :  { %1915 = vperm.xlu1 %2140, %v1853_v0  }
 0x363   :  { %1910 = vperm.xlu0 %2139, %v1852_v53  }
 0x364   :  { %1925 = vperm.xlu1 %2140, %v1855_v56  }
 0x367   :  { %1920 = vperm.xlu0 %2139, %v1854_v1  }
 0x368   :  { %1935 = vperm.xlu1 %2140, %v1857_v2  }
 0x36b   :  { %1930 = vperm.xlu0 %2139, %v1856_v30  }
 0x36c   :  { %1945 = vperm.xlu1 %2140, %v1859_v32   ;;  %v1623_v32 = vld [vmem:[%s3911_s5] sm:$0xff] }
 0x36f   :  { %1940 = vperm.xlu0 %2139, %v1858_v26  }
 0x373   :  { %1950 = vperm.xlu0 %2139, %v1860_v10   ;;  %v1624_v10 = vld [vmem:[%s3911_s5 + $0x8] sm:$0xff] }
 0x392   :  { %v1526_v49 = vpop.xlane.xlu0 %1525 }
 0x393   :  { %v1603_v51 = vmul.f32 0.0051020407, %v1526_v49 }
 0x394   :  { %v1530_v35 = vpop.xlane.xlu1 %1529 }
 0x395   :  { %v1643_v19 = vadd.f32 0.001, %v1603_v51  ;;  %v1604_v23 = vmul.f32 0.0051020407, %v1530_v35 }
 0x397   :  { %2301 = vrsqrt.f32 %v1643_v19  ;;  %v1644_v14 = vadd.f32 0.001, %v1604_v23 }
 0x399   :  { %2303 = vrsqrt.f32 %v1644_v14 }
 0x39a   :  { %v1534_v0 = vpop.xlane.xlu0 %1533 }
 0x39b   :  { %v1605_v53 = vmul.f32 0.0051020407, %v1534_v0 }
 0x39c   :  { %v1538_v56 = vpop.xlane.xlu1 %1537 }
 0x39d   :  { %v1645_v1 = vadd.f32 0.001, %v1605_v53  ;;  %v1606_v2 = vmul.f32 0.0051020407, %v1538_v56 }
 0x39f   :  { %2305 = vrsqrt.f32 %v1645_v1  ;;  %v1646_v30 = vadd.f32 0.001, %v1606_v2  ;;  %v1625_v1 = vld [vmem:[%s3911_s5 + $0x10] sm:$0xff] }
 0x3a1   :  { %v2302_v26 = vpop.eup %2301  ;;  %2307 = vrsqrt.f32 %v1646_v30  ;;  %v1626_v30 = vld [vmem:[%s3911_s5 + $0x18] sm:$0xff] }
 0x3a2   :  { %v1542_v49 = vpop.xlane.xlu0 %1541  ;;  %v1683_v51 = vmul.f32 %v2302_v26, %v1623_v32 }
 0x3a3   :  { %v2304_v35 = vpop.eup %2303  ;;  %v1607_v19 = vmul.f32 0.0051020407, %v1542_v49 }
 0x3a4   :  { %v1546_v23 = vpop.xlane.xlu1 %1545  ;;  %1705 = vperm.xlu0 %2139, %v1683_v51   ;;  %v1684_v14 = vmul.f32 %v2304_v35, %v1624_v10 }
 0x3a5   :  { %v1647_v0 = vadd.f32 0.001, %v1607_v19  ;;  %v1608_v53 = vmul.f32 0.0051020407, %v1546_v23 }
 0x3a6   :  { %1710 = vperm.xlu1 %2140, %v1684_v14  }
 0x3a7   :  { %2309 = vrsqrt.f32 %v1647_v0  ;;  %v1648_v56 = vadd.f32 0.001, %v1608_v53  ;;  %v1627_v0 = vld [vmem:[%s3911_s5 + $0x20] sm:$0xff] }
 0x3a9   :  { %v2306_v2 = vpop.eup %2305  ;;  %2311 = vrsqrt.f32 %v1648_v56  ;;  %v1628_v56 = vld [vmem:[%s3911_s5 + $0x28] sm:$0xff] }
 0x3aa   :  { %v1550_v32 = vpop.xlane.xlu0 %1549  ;;  %v1685_v26 = vmul.f32 %v2306_v2, %v1625_v1 }
 0x3ab   :  { %v2308_v49 = vpop.eup %2307  ;;  %v1609_v51 = vmul.f32 0.0051020407, %v1550_v32 }
 0x3ac   :  { %v1554_v10 = vpop.xlane.xlu1 %1553  ;;  %1715 = vperm.xlu1 %2140, %v1685_v26   ;;  %v1686_v35 = vmul.f32 %v2308_v49, %v1626_v30 }
 0x3ad   :  { %v1649_v19 = vadd.f32 0.001, %v1609_v51  ;;  %v1610_v23 = vmul.f32 0.0051020407, %v1554_v10 }
 0x3ae   :  { %1720 = vperm.xlu0 %2139, %v1686_v35  }
 0x3af   :  { %2313 = vrsqrt.f32 %v1649_v19  ;;  %v1650_v14 = vadd.f32 0.001, %v1610_v23  ;;  %v1629_v19 = vld [vmem:[%s3911_s5 + $0x30] sm:$0xff] }
 0x3b1   :  { %v2310_v53 = vpop.eup %2309  ;;  %2315 = vrsqrt.f32 %v1650_v14  ;;  %v1630_v14 = vld [vmem:[%s3911_s5 + $0x38] sm:$0xff] }
 0x3b2   :  { %v1558_v1 = vpop.xlane.xlu0 %1557  ;;  %v1687_v2 = vmul.f32 %v2310_v53, %v1627_v0 }
 0x3b3   :  { %v2312_v32 = vpop.eup %2311  ;;  %v1611_v26 = vmul.f32 0.0051020407, %v1558_v1 }
 0x3b4   :  { %v1562_v30 = vpop.xlane.xlu1 %1561  ;;  %1725 = vperm.xlu1 %2140, %v1687_v2   ;;  %v1688_v49 = vmul.f32 %v2312_v32, %v1628_v56 }
 0x3b5   :  { %v1651_v51 = vadd.f32 0.001, %v1611_v26  ;;  %v1612_v10 = vmul.f32 0.0051020407, %v1562_v30 }
 0x3b6   :  { %1730 = vperm.xlu0 %2139, %v1688_v49  }
 0x3b7   :  { %2317 = vrsqrt.f32 %v1651_v51  ;;  %v1652_v35 = vadd.f32 0.001, %v1612_v10  ;;  %v1631_v51 = vld [vmem:[%s3911_s5 + $0x40] sm:$0xff] }
 0x3b9   :  { %v2314_v23 = vpop.eup %2313  ;;  %2319 = vrsqrt.f32 %v1652_v35  ;;  %v1632_v35 = vld [vmem:[%s3911_s5 + $0x48] sm:$0xff] }
 0x3ba   :  { %v1566_v0 = vpop.xlane.xlu0 %1565  ;;  %v1689_v53 = vmul.f32 %v2314_v23, %v1629_v19 }
 0x3bb   :  { %v2316_v1 = vpop.eup %2315  ;;  %v1613_v2 = vmul.f32 0.0051020407, %v1566_v0 }
 0x3bc   :  { %v1570_v56 = vpop.xlane.xlu1 %1569  ;;  %1735 = vperm.xlu1 %2140, %v1689_v53   ;;  %v1690_v32 = vmul.f32 %v2316_v1, %v1630_v14 }
 0x3bd   :  { %v1653_v26 = vadd.f32 0.001, %v1613_v2  ;;  %v1614_v30 = vmul.f32 0.0051020407, %v1570_v56 }
 0x3be   :  { %1740 = vperm.xlu0 %2139, %v1690_v32  }
 0x3bf   :  { %2321 = vrsqrt.f32 %v1653_v26  ;;  %v1654_v49 = vadd.f32 0.001, %v1614_v30  ;;  %v1633_v26 = vld [vmem:[%s3911_s5 + $0x50] sm:$0xff] }
 0x3c1   :  { %v2318_v10 = vpop.eup %2317  ;;  %2323 = vrsqrt.f32 %v1654_v49  ;;  %v1634_v49 = vld [vmem:[%s3911_s5 + $0x58] sm:$0xff] }
 0x3c2   :  { %v1574_v19 = vpop.xlane.xlu0 %1573  ;;  %v1691_v23 = vmul.f32 %v2318_v10, %v1631_v51 }
 0x3c3   :  { %v2320_v0 = vpop.eup %2319  ;;  %v1615_v53 = vmul.f32 0.0051020407, %v1574_v19 }
 0x3c4   :  { %v1578_v14 = vpop.xlane.xlu1 %1577  ;;  %1745 = vperm.xlu1 %2140, %v1691_v23   ;;  %v1692_v1 = vmul.f32 %v2320_v0, %v1632_v35 }
 0x3c5   :  { %v1655_v2 = vadd.f32 0.001, %v1615_v53  ;;  %v1616_v56 = vmul.f32 0.0051020407, %v1578_v14 }
 0x3c6   :  { %1750 = vperm.xlu0 %2139, %v1692_v1  }
 0x3c7   :  { %2325 = vrsqrt.f32 %v1655_v2  ;;  %v1656_v32 = vadd.f32 0.001, %v1616_v56  ;;  %v1635_v2 = vld [vmem:[%s3911_s5 + $0x60] sm:$0xff] }
 0x3c9   :  { %v2322_v30 = vpop.eup %2321  ;;  %2327 = vrsqrt.f32 %v1656_v32  ;;  %v1636_v32 = vld [vmem:[%s3911_s5 + $0x68] sm:$0xff] }
 0x3ca   :  { %v1582_v51 = vpop.xlane.xlu0 %1581  ;;  %v1693_v10 = vmul.f32 %v2322_v30, %v1633_v26 }
 0x3cb   :  { %v2324_v19 = vpop.eup %2323  ;;  %v1617_v23 = vmul.f32 0.0051020407, %v1582_v51 }
 0x3cc   :  { %v1586_v35 = vpop.xlane.xlu1 %1585  ;;  %1755 = vperm.xlu1 %2140, %v1693_v10   ;;  %v1694_v0 = vmul.f32 %v2324_v19, %v1634_v49 }
 0x3cd   :  { %v1657_v53 = vadd.f32 0.001, %v1617_v23  ;;  %v1618_v14 = vmul.f32 0.0051020407, %v1586_v35 }
 0x3ce   :  { %1760 = vperm.xlu0 %2139, %v1694_v0  }
 0x3cf   :  { %2329 = vrsqrt.f32 %v1657_v53  ;;  %v1658_v1 = vadd.f32 0.001, %v1618_v14  ;;  %v1637_v53 = vld [vmem:[%s3911_s5 + $0x70] sm:$0xff] }
 0x3d1   :  { %v2326_v56 = vpop.eup %2325  ;;  %2331 = vrsqrt.f32 %v1658_v1  ;;  %v1638_v1 = vld [vmem:[%s3911_s5 + $0x78] sm:$0xff] }
 0x3d2   :  { %v1590_v26 = vpop.xlane.xlu0 %1589  ;;  %v1695_v30 = vmul.f32 %v2326_v56, %v1635_v2 }
 0x3d3   :  { %v2328_v51 = vpop.eup %2327  ;;  %v1619_v10 = vmul.f32 0.0051020407, %v1590_v26 }
 0x3d4   :  { %v1594_v49 = vpop.xlane.xlu1 %1593  ;;  %1765 = vperm.xlu1 %2140, %v1695_v30   ;;  %v1696_v19 = vmul.f32 %v2328_v51, %v1636_v32 }
 0x3d5   :  { %v1659_v23 = vadd.f32 0.001, %v1619_v10  ;;  %v1620_v35 = vmul.f32 0.0051020407, %v1594_v49 }
 0x3d6   :  { %1770 = vperm.xlu0 %2139, %v1696_v19  }
 0x3d7   :  { %2333 = vrsqrt.f32 %v1659_v23  ;;  %v1660_v0 = vadd.f32 0.001, %v1620_v35  ;;  %v1639_v23 = vld [vmem:[%s3911_s5 + $0x80] sm:$0xff] }
 0x3d9   :  { %v2330_v14 = vpop.eup %2329  ;;  %2335 = vrsqrt.f32 %v1660_v0  ;;  %v1640_v0 = vld [vmem:[%s3911_s5 + $0x88] sm:$0xff] }
 0x3da   :  { %v1598_v2 = vpop.xlane.xlu0 %1597  ;;  %v1697_v56 = vmul.f32 %v2330_v14, %v1637_v53 }
 0x3db   :  { %v2332_v26 = vpop.eup %2331  ;;  %v1621_v30 = vmul.f32 0.0051020407, %v1598_v2 }
 0x3dc   :  { %v1602_v32 = vpop.xlane.xlu1 %1601  ;;  %1775 = vperm.xlu1 %2140, %v1697_v56   ;;  %v1698_v51 = vmul.f32 %v2332_v26, %v1638_v1  ;;  %v1641_v1 = vld [vmem:[%s3911_s5 + $0x90] sm:$0xff]  ;;  %v1642_v26 = vld [vmem:[%s3911_s5 + $0x98] sm:$0xff] }
 0x3dd   :  { %v1661_v10 = vadd.f32 0.001, %v1621_v30  ;;  %v1622_v49 = vmul.f32 0.0051020407, %v1602_v32 }
 0x3de   :  { %1780 = vperm.xlu0 %2139, %v1698_v51  }
 0x3df   :  { %2337 = vrsqrt.f32 %v1661_v10  ;;  %v1662_v19 = vadd.f32 0.001, %v1622_v49  ;;  %v1861_v10 = vld [vmem:[%s3908_s6 + $0x90] sm:$0xff]  ;;  %v1862_v49 = vld [vmem:[%s3908_s6 + $0x98] sm:$0xff] }
 0x3e1   :  { %v2334_v35 = vpop.eup %2333  ;;  %2339 = vrsqrt.f32 %v1662_v19 }
 0x3e2   :  { %v1699_v53 = vmul.f32 %v2334_v35, %v1639_v23  ;;  %v3671_v19 = vpop.permute.xlu0 %1910  ;;  %v3675_v35 = vpop.permute.xlu1 %1915 }
 0x3e3   :  { %v2336_v14 = vpop.eup %2335 }
 0x3e4   :  { %1785 = vperm.xlu1 %2140, %v1699_v53   ;;  %v1700_v2 = vmul.f32 %v2336_v14, %v1640_v0 }
 0x3e6   :  { %1790 = vperm.xlu0 %2139, %v1700_v2   ;;  %v3673_v23 = vpop.permute.xlu0 %1920  ;;  %v3679_v53 = vpop.permute.xlu1 %1925 }
 0x3e9   :  { %v2338_v56 = vpop.eup %2337 }
 0x3ea   :  { %v1701_v30 = vmul.f32 %v2338_v56, %v1641_v1  ;;  %v3677_v0 = vpop.permute.xlu0 %1930  ;;  %v3683_v2 = vpop.permute.xlu1 %1935 }
 0x3eb   :  { %v2340_v32 = vpop.eup %2339 }
 0x3ec   :  { %1795 = vperm.xlu1 %2140, %v1701_v30   ;;  %v1702_v51 = vmul.f32 %v2340_v32, %v1642_v26 }
 0x3ee   :  { %1800 = vperm.xlu0 %2139, %v1702_v51   ;;  %v3681_v14 = vpop.permute.xlu0 %1940  ;;  %v3687_v56 = vpop.permute.xlu1 %1945 }
 0x3f0   :  { %1955 = vperm.xlu1 %2140, %v1861_v10  }
 0x3f2   :  { %1960 = vperm.xlu0 %2139, %v1862_v49   ;;  %v3685_v1 = vpop.permute.xlu0 %1950 }
 0x423   :  { %v1706_v26 = vpop.permute.xlu0 %1705 }
 0x424   :  { %v1803_v30 = vmul.f32 %v1706_v26, %v3355_v43  ;;  %v1804_v32 = vmul.f32 %v1706_v26, %v3358_v44 }
 0x425   :  { %v1711_v51 = vpop.permute.xlu1 %1710 }
 0x426   :  { %v1963_v10 = vadd.f32 %v3340_v13, %v1803_v30  ;;  %v1964_v49 = vadd.f32 %v3340_v13, %v1804_v32  ;;  %v1805_v60 = vmul.f32 %v1711_v51, %v3365_v50  ;;  %v1806_v40 = vmul.f32 %v1711_v51, %v3368_v52 }
 0x428   :  { %2003 = vst [vmem:[%s3912_s7] sm:$0xff] %v1963_v10  ;;  %2004 = vst.msk [vmem:[%s3912_s7 + $0x8] sm:$0xff] %vm1342_vm2, %v1964_v49  ;;  %v1965_v43 = vadd.f32 %v3344_v17, %v1805_v60  ;;  %v1966_v44 = vadd.f32 %v3344_v17, %v1806_v40 }
 0x42a   :  { %2005 = vst [vmem:[%s3912_s7 + $0x10] sm:$0xff] %v1965_v43  ;;  %2006 = vst.msk [vmem:[%s3912_s7 + $0x18] sm:$0xff] %vm1342_vm2, %v1966_v44 }
 0x42b   :  { %v1716_v13 = vpop.permute.xlu1 %1715 }
 0x42c   :  { %v1807_v50 = vmul.f32 %v1716_v13, %v3377_v11  ;;  %v1808_v52 = vmul.f32 %v1716_v13, %v3380_v61 }
 0x42d   :  { %v1721_v26 = vpop.permute.xlu0 %1720 }
 0x42e   :  { %v1967_v30 = vadd.f32 %v3342_v15, %v1807_v50  ;;  %v1968_v60 = vadd.f32 %v3342_v15, %v1808_v52  ;;  %v1809_v17 = vmul.f32 %v1721_v26, %v3387_v45  ;;  %v1810_v40 = vmul.f32 %v1721_v26, %v3390_v47 }
 0x430   :  { %2007 = vst [vmem:[%s3912_s7 + $0x20] sm:$0xff] %v1967_v30  ;;  %2008 = vst.msk [vmem:[%s3912_s7 + $0x28] sm:$0xff] %vm1342_vm2, %v1968_v60  ;;  %v1969_v11 = vadd.f32 %v3348_v25, %v1809_v17  ;;  %v1970_v61 = vadd.f32 %v3348_v25, %v1810_v40 }
 0x432   :  { %2009 = vst [vmem:[%s3912_s7 + $0x30] sm:$0xff] %v1969_v11  ;;  %2010 = vst.msk [vmem:[%s3912_s7 + $0x38] sm:$0xff] %vm1342_vm2, %v1970_v61 }
 0x433   :  { %v1726_v15 = vpop.permute.xlu1 %1725 }
 0x434   :  { %v1811_v45 = vmul.f32 %v1726_v15, %v3399_v5  ;;  %v1812_v47 = vmul.f32 %v1726_v15, %v3402_v8 }
 0x435   :  { %v1731_v32 = vpop.permute.xlu0 %1730 }
 0x436   :  { %v1971_v51 = vadd.f32 %v3346_v21, %v1811_v45  ;;  %v1972_v10 = vadd.f32 %v3346_v21, %v1812_v47  ;;  %v1813_v25 = vmul.f32 %v1731_v32, %v3409_v31  ;;  %v1814_v49 = vmul.f32 %v1731_v32, %v3412_v33 }
 0x438   :  { %2011 = vst [vmem:[%s3912_s7 + $0x40] sm:$0xff] %v1971_v51  ;;  %2012 = vst.msk [vmem:[%s3912_s7 + $0x48] sm:$0xff] %vm1342_vm2, %v1972_v10  ;;  %v1973_v5 = vadd.f32 %v3352_v29, %v1813_v25  ;;  %v1974_v8 = vadd.f32 %v3352_v29, %v1814_v49 }
 0x43a   :  { %2013 = vst [vmem:[%s3912_s7 + $0x50] sm:$0xff] %v1973_v5  ;;  %2014 = vst.msk [vmem:[%s3912_s7 + $0x58] sm:$0xff] %vm1342_vm2, %v1974_v8 }
 0x43b   :  { %v1736_v21 = vpop.permute.xlu1 %1735 }
 0x43c   :  { %v1815_v31 = vmul.f32 %v1736_v21, %v3421_v58  ;;  %v1816_v33 = vmul.f32 %v1736_v21, %v3424_v24 }
 0x43d   :  { %v1741_v43 = vpop.permute.xlu0 %1740 }
 0x43e   :  { %v1975_v44 = vadd.f32 %v3350_v27, %v1815_v31  ;;  %v1976_v13 = vadd.f32 %v3350_v27, %v1816_v33  ;;  %v1817_v29 = vmul.f32 %v1741_v43, %v3431_v7  ;;  %v1818_v50 = vmul.f32 %v1741_v43, %v3434_v9 }
 0x440   :  { %2015 = vst [vmem:[%s3912_s7 + $0x60] sm:$0xff] %v1975_v44  ;;  %2016 = vst.msk [vmem:[%s3912_s7 + $0x68] sm:$0xff] %vm1342_vm2, %v1976_v13  ;;  %v1977_v58 = vadd.f32 %v3601_v12, %v1817_v29  ;;  %v1978_v24 = vadd.f32 %v3601_v12, %v1818_v50  ;;  %v3917_v44 = vld [vmem:[#allocation2_spill] sm:$0xff]  ;;  %v3918_v29 = vld [vmem:[#allocation3_spill] sm:$0xff] }
 0x442   :  { %2017 = vst [vmem:[%s3912_s7 + $0x70] sm:$0xff] %v1977_v58  ;;  %2018 = vst.msk [vmem:[%s3912_s7 + $0x78] sm:$0xff] %vm1342_vm2, %v1978_v24 }
 0x443   :  { %v1746_v27 = vpop.permute.xlu1 %1745 }
 0x444   :  { %v1819_v7 = vmul.f32 %v1746_v27, %v3443_v48  ;;  %v1820_v9 = vmul.f32 %v1746_v27, %v3446_v42 }
 0x445   :  { %v1751_v52 = vpop.permute.xlu0 %1750 }
 0x446   :  { %v1979_v26 = vadd.f32 %v3603_v46, %v1819_v7  ;;  %v1980_v30 = vadd.f32 %v3603_v46, %v1820_v9  ;;  %v1821_v12 = vmul.f32 %v1751_v52, %v3453_v4  ;;  %v1822_v60 = vmul.f32 %v1751_v52, %v3456_v63 }
 0x448   :  { %2019 = vst [vmem:[%s3912_s7 + $0x80] sm:$0xff] %v1979_v26  ;;  %2020 = vst.msk [vmem:[%s3912_s7 + $0x88] sm:$0xff] %vm1342_vm2, %v1980_v30  ;;  %v1981_v48 = vadd.f32 %v3671_v19, %v1821_v12  ;;  %v1982_v42 = vadd.f32 %v3671_v19, %v1822_v60 }
 0x44a   :  { %2021 = vst [vmem:[%s3912_s7 + $0x90] sm:$0xff] %v1981_v48  ;;  %2022 = vst.msk [vmem:[%s3912_s7 + $0x98] sm:$0xff] %vm1342_vm2, %v1982_v42 }
 0x44b   :  { %v1756_v4 = vpop.permute.xlu1 %1755 }
 0x44c   :  { %v1823_v63 = vmul.f32 %v1756_v4, %v3465_v37  ;;  %v1824_v46 = vmul.f32 %v1756_v4, %v3468_v41 }
 0x44d   :  { %v1761_v17 = vpop.permute.xlu0 %1760 }
 0x44e   :  { %v1983_v40 = vadd.f32 %v3675_v35, %v1823_v63  ;;  %v1984_v11 = vadd.f32 %v3675_v35, %v1824_v46  ;;  %v1825_v19 = vmul.f32 %v1761_v17, %v3475_v54  ;;  %v1826_v61 = vmul.f32 %v1761_v17, %v3478_v55 }
 0x450   :  { %2023 = vst [vmem:[%s3912_s7 + $0xa0] sm:$0xff] %v1983_v40  ;;  %2024 = vst.msk [vmem:[%s3912_s7 + $0xa8] sm:$0xff] %vm1342_vm2, %v1984_v11  ;;  %v1985_v37 = vadd.f32 %v3673_v23, %v1825_v19  ;;  %v1986_v41 = vadd.f32 %v3673_v23, %v1826_v61 }
 0x452   :  { %2025 = vst [vmem:[%s3912_s7 + $0xb0] sm:$0xff] %v1985_v37  ;;  %2026 = vst.msk [vmem:[%s3912_s7 + $0xb8] sm:$0xff] %vm1342_vm2, %v1986_v41 }
 0x453   :  { %v1766_v54 = vpop.permute.xlu1 %1765 }
 0x454   :  { %v1827_v55 = vmul.f32 %v1766_v54, %v3487_v59  ;;  %v1828_v35 = vmul.f32 %v1766_v54, %v3490_v16 }
 0x455   :  { %v1771_v15 = vpop.permute.xlu0 %1770 }
 0x456   :  { %v1987_v45 = vadd.f32 %v3679_v53, %v1827_v55  ;;  %v1988_v47 = vadd.f32 %v3679_v53, %v1828_v35  ;;  %v1829_v23 = vmul.f32 %v1771_v15, %v3497_v57  ;;  %v1830_v32 = vmul.f32 %v1771_v15, %v3500_v3 }
 0x458   :  { %2027 = vst [vmem:[%s3912_s7 + $0xc0] sm:$0xff] %v1987_v45  ;;  %2028 = vst.msk [vmem:[%s3912_s7 + $0xc8] sm:$0xff] %vm1342_vm2, %v1988_v47  ;;  %v1989_v59 = vadd.f32 %v3677_v0, %v1829_v23  ;;  %v1990_v16 = vadd.f32 %v3677_v0, %v1830_v32 }
 0x45a   :  { %2029 = vst [vmem:[%s3912_s7 + $0xd0] sm:$0xff] %v1989_v59  ;;  %2030 = vst.msk [vmem:[%s3912_s7 + $0xd8] sm:$0xff] %vm1342_vm2, %v1990_v16 }
 0x45b   :  { %v1776_v57 = vpop.permute.xlu1 %1775 }
 0x45c   :  { %v1831_v3 = vmul.f32 %v1776_v57, %v3509_v6  ;;  %v1832_v53 = vmul.f32 %v1776_v57, %v3512_v39 }
 0x45d   :  { %v1781_v51 = vpop.permute.xlu0 %1780 }
 0x45e   :  { %v1991_v10 = vadd.f32 %v3683_v2, %v1831_v3  ;;  %v1992_v25 = vadd.f32 %v3683_v2, %v1832_v53  ;;  %v1833_v0 = vmul.f32 %v1781_v51, %v3519_v18  ;;  %v1834_v49 = vmul.f32 %v1781_v51, %v3522_v20 }
 0x460   :  { %2031 = vst [vmem:[%s3912_s7 + $0xe0] sm:$0xff] %v1991_v10  ;;  %2032 = vst.msk [vmem:[%s3912_s7 + $0xe8] sm:$0xff] %vm1342_vm2, %v1992_v25  ;;  %v1993_v6 = vadd.f32 %v3681_v14, %v1833_v0  ;;  %v1994_v39 = vadd.f32 %v3681_v14, %v1834_v49 }
 0x462   :  { %2033 = vst [vmem:[%s3912_s7 + $0xf0] sm:$0xff] %v1993_v6  ;;  %2034 = vst.msk [vmem:[%s3912_s7 + $0xf8] sm:$0xff] %vm1342_vm2, %v1994_v39 }
 0x463   :  { %v1786_v18 = vpop.permute.xlu1 %1785 }
 0x464   :  { %v1835_v20 = vmul.f32 %v1786_v18, %v3531_v22  ;;  %v1836_v2 = vmul.f32 %v1786_v18, %v3534_v62 }
 0x465   :  { %v1791_v5 = vpop.permute.xlu0 %1790 }
 0x466   :  { %v1995_v8 = vadd.f32 %v3687_v56, %v1835_v20  ;;  %v1996_v21 = vadd.f32 %v3687_v56, %v1836_v2  ;;  %v1837_v14 = vmul.f32 %v1791_v5, %v3541_v34  ;;  %v1838_v31 = vmul.f32 %v1791_v5, %v3544_v36 }
 0x468   :  { %2035 = vst [vmem:[%s3912_s7 + $0x100] sm:$0xff] %v1995_v8  ;;  %2036 = vst.msk [vmem:[%s3912_s7 + $0x108] sm:$0xff] %vm1342_vm2, %v1996_v21  ;;  %v1997_v22 = vadd.f32 %v3685_v1, %v1837_v14  ;;  %v1998_v62 = vadd.f32 %v3685_v1, %v1838_v31 }
 0x46a   :  { %2037 = vst [vmem:[%s3912_s7 + $0x110] sm:$0xff] %v1997_v22  ;;  %2038 = vst.msk [vmem:[%s3912_s7 + $0x118] sm:$0xff] %vm1342_vm2, %v1998_v62 }
 0x46b   :  { %v1796_v34 = vpop.permute.xlu1 %1795 }
 0x46c   :  { %v1839_v56 = vmul.f32 %v1796_v34, %v3553_v38  ;;  %v1840_v33 = vmul.f32 %v1796_v34, %v3556_v28 }
 0x46d   :  { %v1801_v36 = vpop.permute.xlu0 %1800 }
 0x46e   :  { %v1841_v13 = vmul.f32 %v1801_v36, %v3917_v44  ;;  %v1842_v1 = vmul.f32 %v1801_v36, %v3918_v29 }
 0x46f   :  { %v1956_v43 = vpop.permute.xlu1 %1955 }
 0x470   :  { %v1999_v50 = vadd.f32 %v1956_v43, %v1839_v56  ;;  %v2000_v58 = vadd.f32 %v1956_v43, %v1840_v33 }
 0x471   :  { %v1961_v24 = vpop.permute.xlu0 %1960 }
 0x472   :  { %2039 = vst [vmem:[%s3912_s7 + $0x120] sm:$0xff] %v1999_v50  ;;  %2040 = vst.msk [vmem:[%s3912_s7 + $0x128] sm:$0xff] %vm1342_vm2, %v2000_v58  ;;  %v2001_v38 = vadd.f32 %v1961_v24, %v1841_v13  ;;  %v2002_v27 = vadd.f32 %v1961_v24, %v1842_v1 }
 0x474   :  { %2041 = vst [vmem:[%s3912_s7 + $0x130] sm:$0xff] %v2001_v38  ;;  %2042 = vst.msk [vmem:[%s3912_s7 + $0x138] sm:$0xff] %vm1342_vm2, %v2002_v27 }

</bundles_post_ra>
